<compile_context>
chip_gen: v6e
topology: v6e:2x2x1
jax: 0.10.0
libtpu: 0.0.40
codegen_flags: <defaults>
</compile_context>

<pallas_src>
import functools

import jax
import jax.numpy as jnp
from jax import lax
from jax.experimental import pallas as pl
from jax.experimental.pallas import tpu as pltpu


def _round_up(x, m):
    return ((x + m - 1) // m) * m


def _block_vmem_bytes(bb, t, ip, hp, p):
    """Rough per-grid-step VMEM footprint (double-buffered blocks + scratch)."""
    blocks = bb * t * (ip + hp + p) + 2 * bb * hp          # x, y, heads, h0, hT
    weights = ip * hp + hp * hp + hp * p + hp + p
    scratch = 2 * t * bb * hp                              # xw + y time-major
    return 4 * (2 * (blocks + weights) + scratch)


def _pick_batch_block(B, T, Ip, Hp, P):
    """Choose the batch block: big enough to feed the MXU, >=2 grid steps for
    B >= 16 (so v7x's two TensorCores split the 'parallel' batch axis), and
    small enough to fit the default scoped-VMEM budget on every chip."""
    bp8 = _round_up(max(B, 1), 8)
    if B >= 16:
        target = _round_up(pl.cdiv(bp8, 2), 8)   # at least a 2-step grid
    else:
        target = bp8                              # tiny batch: one block
    budget = 12 * 1024 * 1024                     # < v5e's 16 MiB default scope
    bb = min(target, 256)
    while bb > 8 and _block_vmem_bytes(bb, T, Ip, Hp, P) > budget:
        bb -= 8
    return max(bb, 8)


# ----------------------------------------------------------------------------
# Fused kernel: tanh-RNN recurrence over the whole sequence + MDN heads.
# ----------------------------------------------------------------------------
def mdnrnn_kernel(x_ref, h0_ref, wih_ref, whh_ref, b_ref, wh_ref, bh_ref,
                  y_ref, hT_ref, heads_ref, xw_scr, ytm_scr,
                  *, n_components, kz):
    # Per batch-block shapes (padded to (8, 128) sublane/lane tiles):
    #   x_ref:     (Bb, T, Ip)  batch-major input slab (f32 or bf16)
    #   h0_ref:    (Bb, Hp)     initial hidden state (f32)
    #   wih_ref:   (Ip, Hp)     input->hidden weight (x @ W layout)
    #   whh_ref:   (Hp, Hp)     hidden->hidden weight
    #   b_ref:     (1, Hp)      combined RNN bias (b_ih + b_hh), f32
    #   wh_ref:    (Hp, P)      fused head weight [w_pi | w_mu | w_logsig | 0]
    #   bh_ref:    (1, P)       fused head bias, f32
    #   y_ref:     (Bb, T, Hp)  all hidden states, batch-major (f32)
    #   hT_ref:    (Bb, Hp)     final hidden state (f32)
    #   heads_ref: (Bb, T, P)   [softmax(pi) | mu | exp(logsig) | 0], batch-major
    #   xw_scr:    (T, Bb, Hp)  VMEM scratch: projected inputs, time-major
    #   ytm_scr:   (T, Bb, Hp)  VMEM scratch: hidden states, time-major
    Bb, T, Ip = x_ref.shape
    Hp = h0_ref.shape[-1]
    P = heads_ref.shape[-1]
    K = n_components
    KZ = kz

    w_dt = wih_ref.dtype
    bias = b_ref[...]

    # Hoisted input projection: one (Bb*T, Ip) x (Ip, Hp) MXU matmul (bias
    # folded in) off the serial critical path, then spilled time-major to a
    # VMEM scratch so the unrolled recurrence reads (Bb, Hp) rows per step
    # from the plentiful vld slots instead of pinning vregs.
    xw = jnp.dot(x_ref[...].reshape(Bb * T, Ip).astype(w_dt), wih_ref[...],
                 preferred_element_type=jnp.float32) + bias
    xw_scr[...] = jnp.transpose(xw.reshape(Bb, T, Hp), (1, 0, 2))

    # Sequential recurrence, fully unrolled (T static & small).  W_hh stays
    # resident in vregs.  NOTE: explicit weight-stationary MXU driving
    # (matmul_push_rhs / matmul_acc_lhs / matmul_pop) was evaluated here but
    # kept on jnp.dot for portable accumulator semantics across MRF/MRB chips.
    whh = whh_ref[...]
    h = h0_ref[...]
    for t in range(T):
        pre = jnp.dot(h.astype(w_dt), whh,
                      preferred_element_type=jnp.float32) + xw_scr[t]
        h = jnp.tanh(pre)
        ytm_scr[t] = h
    hT_ref[...] = h

    # One XLU permute of the VMEM-resident hidden states to batch-major; both
    # output stores below are then contiguous, lane-dense, unmasked slabs and
    # no HBM transpose pass is needed in the wrapper.
    y_bm = jnp.transpose(ytm_scr[...], (1, 0, 2))          # (Bb, T, Hp)
    y_ref[...] = y_bm

    # Fused MDN heads: one lane-dense (Hp x P) matmul on the batch-major rows
    # (no HBM round trip for y).
    z = jnp.dot(y_bm.reshape(Bb * T, Hp).astype(w_dt), wh_ref[...],
                preferred_element_type=jnp.float32) + bh_ref[...]

    # Lane masks for the three head regions inside the padded 128-wide slab.
    col = lax.broadcasted_iota(jnp.int32, z.shape, dimension=1)
    pi_mask = col < K
    mu_mask = (col >= K) & (col < K + KZ)
    sig_mask = (col >= K + KZ) & (col < K + 2 * KZ)

    # Single exp feeds both the softmax numerator (pi columns, shifted by the
    # row max) and sigma = exp(logsigma) (sigma columns, unshifted).
    neg_big = jnp.finfo(jnp.float32).min
    m = jnp.max(jnp.where(pi_mask, z, neg_big), axis=-1, keepdims=True)
    e_all = jnp.exp(jnp.where(pi_mask, z - m, z))
    e_pi = jnp.where(pi_mask, e_all, 0.0)
    s = jnp.sum(e_pi, axis=-1, keepdims=True)
    pi_vals = e_pi / s                                      # exact normalization

    out = jnp.where(pi_mask, pi_vals,
                    jnp.where(mu_mask, z,
                              jnp.where(sig_mask, e_all, 0.0)))
    heads_ref[...] = out.reshape(Bb, T, P)


# ----------------------------------------------------------------------------
# Parameter construction (deterministic, PyTorch-style U(-1/sqrt(H), 1/sqrt(H)))
# ----------------------------------------------------------------------------
def init_params(key, z_dim, a_dim, hid_dim, n_components):
    inp_dim = z_dim + a_dim
    bound = 1.0 / jnp.sqrt(jnp.float32(hid_dim))
    ks = jax.random.split(key, 10)

    def u(k, shape):
        return jax.random.uniform(k, shape, jnp.float32, -bound, bound)

    return {
        # RNN weights stored transposed so the kernel does x @ W
        "w_ih": u(ks[0], (inp_dim, hid_dim)),
        "w_hh": u(ks[1], (hid_dim, hid_dim)),
        "b_ih": u(ks[2], (hid_dim,)),
        "b_hh": u(ks[3], (hid_dim,)),
        # heads (also transposed: (in, out))
        "w1": u(ks[4], (hid_dim, n_components)),
        "b1": u(ks[5], (n_components,)),
        "w2": u(ks[6], (hid_dim, n_components * z_dim)),
        "b2": u(ks[7], (n_components * z_dim,)),
        "w3": u(ks[8], (hid_dim, n_components * z_dim)),
        "b3": u(ks[9], (n_components * z_dim,)),
    }


# ----------------------------------------------------------------------------
# Wrapper reproducing MDNRNN.forward(x, h) -> ((pi, mu, sigma), y, states)
# ----------------------------------------------------------------------------
def mdnrnn_forward(params, x, h, *, z_dim, n_components, batch_block=None,
                   weight_dtype=jnp.float32):
    B, T, I = x.shape
    H = params["w_hh"].shape[0]
    K = n_components
    KZ = K * z_dim
    C = K + 2 * KZ              # real fused head width: [pi | mu | logsigma]

    # Hardware-tile padding: lane dims -> multiple of 128, batch -> mult. of 8.
    Ip = _round_up(I, 128)
    Hp = _round_up(H, 128)
    P = _round_up(C, 128)
    Bb = _round_up(batch_block, 8) if batch_block else _pick_batch_block(
        B, T, Ip, Hp, P)
    Bp = _round_up(B, Bb)

    f32 = jnp.float32

    # Batch-major everywhere: no HBM transpose pass on x or on the outputs.
    x_p = jnp.pad(x.astype(f32), ((0, Bp - B), (0, 0), (0, Ip - I)))
    h0 = jnp.pad(h[0].astype(f32), ((0, Bp - B), (0, Hp - H)))

    w_ih = jnp.pad(params["w_ih"].astype(f32),
                   ((0, Ip - I), (0, Hp - H))).astype(weight_dtype)
    w_hh = jnp.pad(params["w_hh"].astype(f32),
                   ((0, Hp - H), (0, Hp - H))).astype(weight_dtype)
    bias = jnp.pad((params["b_ih"] + params["b_hh"]).astype(f32).reshape(1, H),
                   ((0, 0), (0, Hp - H)))

    w_heads = jnp.concatenate(
        [params["w1"], params["w2"], params["w3"]], axis=1).astype(f32)  # (H, C)
    w_heads = jnp.pad(w_heads, ((0, Hp - H), (0, P - C))).astype(weight_dtype)
    b_heads = jnp.concatenate(
        [params["b1"], params["b2"], params["b3"]]).astype(f32).reshape(1, C)
    b_heads = jnp.pad(b_heads, ((0, 0), (0, P - C)))

    kernel = functools.partial(mdnrnn_kernel, n_components=K, kz=KZ)
    rep2 = lambda b: (0, 0)      # replicated 2-D operands (weights / biases)

    flops = 2 * T * Bp * (Ip * Hp + Hp * Hp + Hp * P)
    transcendentals = T * Bp * (Hp + P)
    bytes_accessed = 4 * (T * Bp * (Ip + Hp + P) + 2 * Bp * Hp
                          + Ip * Hp + Hp * Hp + Hp * P + Hp + P)

    y_p, hT_p, heads_p = pl.pallas_call(
        kernel,
        out_shape=(
            jax.ShapeDtypeStruct((Bp, T, Hp), f32),
            jax.ShapeDtypeStruct((Bp, Hp), f32),
            jax.ShapeDtypeStruct((Bp, T, P), f32),
        ),
        grid=(Bp // Bb,),
        in_specs=[
            pl.BlockSpec((Bb, T, Ip), lambda b: (b, 0, 0)),
            pl.BlockSpec((Bb, Hp), lambda b: (b, 0)),
            pl.BlockSpec((Ip, Hp), rep2),
            pl.BlockSpec((Hp, Hp), rep2),
            pl.BlockSpec((1, Hp), rep2),
            pl.BlockSpec((Hp, P), rep2),
            pl.BlockSpec((1, P), rep2),
        ],
        out_specs=(
            pl.BlockSpec((Bb, T, Hp), lambda b: (b, 0, 0)),
            pl.BlockSpec((Bb, Hp), lambda b: (b, 0)),
            pl.BlockSpec((Bb, T, P), lambda b: (b, 0, 0)),
        ),
        scratch_shapes=[
            pltpu.VMEM((T, Bb, Hp), f32),   # time-major projected inputs
            pltpu.VMEM((T, Bb, Hp), f32),   # time-major hidden states
        ],
        # Independent per-batch recurrences: "parallel" so v7x's 2 TensorCores
        # split the (>=2-step for B>=16) batch grid; harmless on v5e/v6e.
        compiler_params=pltpu.CompilerParams(
            dimension_semantics=("parallel",)),
        cost_estimate=pl.CostEstimate(
            flops=flops, transcendentals=transcendentals,
            bytes_accessed=bytes_accessed),
    )(x_p, h0, w_ih, w_hh, bias, w_heads, b_heads)

    # Strip padding only — outputs are already batch-major, no transposes.
    y = y_p[:B, :, :H]                                      # (B, T, H)
    states = hT_p[:B, :H][None]                             # (1, B, H)
    heads = heads_p[:B, :, :C]                              # (B, T, C)

    pi = heads[:, :, :K].reshape(B, T, K, 1)
    mu = heads[:, :, K:K + KZ].reshape(B, T, K, z_dim)
    sigma = heads[:, :, K + KZ:].reshape(B, T, K, z_dim)
    return (pi, mu, sigma), y, states


# ----------------------------------------------------------------------------
# Pure-JAX reference for sanity checking.
# ----------------------------------------------------------------------------
def mdnrnn_reference(params, x, h, *, z_dim, n_components):
    B, T, I = x.shape
    K = n_components
    bias = params["b_ih"] + params["b_hh"]

    def step(hprev, x_t):
        hnew = jnp.tanh(x_t @ params["w_ih"] + hprev @ params["w_hh"] + bias)
        return hnew, hnew

    hT, y_tm = lax.scan(step, h[0], jnp.transpose(x, (1, 0, 2)))
    y = jnp.transpose(y_tm, (1, 0, 2))
    logits = y @ params["w1"] + params["b1"]
    pi = jax.nn.softmax(logits, axis=-1).reshape(B, T, K, 1)
    mu = (y @ params["w2"] + params["b2"]).reshape(B, T, K, z_dim)
    sigma = jnp.exp(y @ params["w3"] + params["b3"]).reshape(B, T, K, z_dim)
    return (pi, mu, sigma), y, hT[None]


if __name__ == "__main__":
    # Small shapes consistent with the module:
    #   z_dim=4, a_dim=2 -> inp_dim=6, hid_dim=32, n_components=3, n_layers=1
    #   x: (B=2, T=8, inp_dim=6), h: (n_layers=1, B=2, hid_dim=32)
    z_dim, a_dim, hid_dim, n_components = 4, 2, 32, 3
    B, T = 2, 8

    key = jax.random.PRNGKey(0)
    kp, kx, kh = jax.random.split(key, 3)
    params = init_params(kp, z_dim, a_dim, hid_dim, n_components)
    x = jax.random.normal(kx, (B, T, z_dim + a_dim), jnp.float32)
    h = jnp.zeros((1, B, hid_dim), jnp.float32)

    fwd = jax.jit(functools.partial(
        mdnrnn_forward, z_dim=z_dim, n_components=n_components))
    (pi, mu, sigma), y, states = fwd(params, x, h)
    jax.block_until_ready((pi, mu, sigma, y, states))

    # Sanity check against the pure-JAX reference (default matmul precision on
    # both sides; use precision=HIGHEST on both if strict fp32 parity with a
    # CPU/GPU PyTorch run were required).
    (pi_r, mu_r, sig_r), y_r, st_r = mdnrnn_reference(
        params, x, h, z_dim=z_dim, n_components=n_components)
    assert pi.shape == (B, T, n_components, 1)
    assert mu.shape == (B, T, n_components, z_dim)
    assert sigma.shape == (B, T, n_components, z_dim)
    assert y.shape == (B, T, hid_dim)
    assert states.shape == (1, B, hid_dim)
    for a, b in [(pi, pi_r), (mu, mu_r), (sigma, sig_r), (y, y_r),
                 (states, st_r)]:
        assert jnp.allclose(a, b, atol=1e-5, rtol=1e-5)

    print("KERNEL_OK")
</pallas_src>

<mosaic_0001>
module attributes {stable_mosaic.version = 11 : i64} {
  func.func @mdnrnn_kernel(%arg0: i32, %arg1: memref<8x8x128xf32, #tpu.memory_space<vmem>>, %arg2: memref<8x128xf32, #tpu.memory_space<vmem>>, %arg3: memref<128x128xf32, #tpu.memory_space<vmem>>, %arg4: memref<128x128xf32, #tpu.memory_space<vmem>>, %arg5: memref<1x128xf32, #tpu.memory_space<vmem>>, %arg6: memref<128x128xf32, #tpu.memory_space<vmem>>, %arg7: memref<1x128xf32, #tpu.memory_space<vmem>>, %arg8: memref<8x8x128xf32, #tpu.memory_space<vmem>>, %arg9: memref<8x128xf32, #tpu.memory_space<vmem>>, %arg10: memref<8x8x128xf32, #tpu.memory_space<vmem>>, %arg11: memref<8x8x128xf32, #tpu.memory_space<vmem>>, %arg12: memref<8x8x128xf32, #tpu.memory_space<vmem>>) attributes {dimension_semantics = [#tpu.dimension_semantics<parallel>], iteration_bounds = array<i64: 1>, scalar_prefetch = 0 : i64, scratch_operands = 2 : i64, tpu.core_type = #tpu.core_type<tc>, window_params = [{transform_indices = @transform_0, window_bounds = array<i64: 8, 8, 128>}, {transform_indices = @transform_1, window_bounds = array<i64: 8, 128>}, {pipeline_mode = #tpu.pipeline_mode<synchronous>, transform_indices = @transform_2, window_bounds = array<i64: 128, 128>}, {pipeline_mode = #tpu.pipeline_mode<synchronous>, transform_indices = @transform_3, window_bounds = array<i64: 128, 128>}, {pipeline_mode = #tpu.pipeline_mode<synchronous>, transform_indices = @transform_4, window_bounds = array<i64: 1, 128>}, {pipeline_mode = #tpu.pipeline_mode<synchronous>, transform_indices = @transform_5, window_bounds = array<i64: 128, 128>}, {pipeline_mode = #tpu.pipeline_mode<synchronous>, transform_indices = @transform_6, window_bounds = array<i64: 1, 128>}, {transform_indices = @transform_7, window_bounds = array<i64: 8, 8, 128>}, {transform_indices = @transform_8, window_bounds = array<i64: 8, 128>}, {transform_indices = @transform_9, window_bounds = array<i64: 8, 8, 128>}]} {
    %c0 = arith.constant 0 : index
    %c0_0 = arith.constant 0 : index
    %0 = vector.load %arg5[%c0, %c0_0] : memref<1x128xf32, #tpu.memory_space<vmem>>, vector<1x128xf32>
    %c0_1 = arith.constant 0 : index
    %c0_2 = arith.constant 0 : index
    %c0_3 = arith.constant 0 : index
    %1 = vector.load %arg1[%c0_1, %c0_2, %c0_3] : memref<8x8x128xf32, #tpu.memory_space<vmem>>, vector<8x8x128xf32>
    %2 = vector.shape_cast %1 : vector<8x8x128xf32> to vector<64x128xf32>
    %c0_4 = arith.constant 0 : index
    %c0_5 = arith.constant 0 : index
    %3 = vector.load %arg3[%c0_4, %c0_5] : memref<128x128xf32, #tpu.memory_space<vmem>>, vector<128x128xf32>
    %cst = arith.constant dense<0.000000e+00> : vector<64x128xf32>
    %4 = tpu.matmul %2, %3, %cst {dimension_numbers = #tpu.dot_dimension_numbers<[1], [0], [0], [1], [0, 0, 1, 1], [], []>} : vector<64x128xf32>, vector<128x128xf32>, vector<64x128xf32> -> vector<64x128xf32>
    %5 = vector.broadcast %0 : vector<1x128xf32> to vector<64x128xf32>
    %6 = arith.addf %4, %5 : vector<64x128xf32>
    %7 = vector.shape_cast %6 : vector<64x128xf32> to vector<8x8x128xf32>
    %8 = tpu.transpose %7, [1, 0, 2] : vector<8x8x128xf32> -> vector<8x8x128xf32>
    %c0_6 = arith.constant 0 : index
    %c0_7 = arith.constant 0 : index
    %c0_8 = arith.constant 0 : index
    %9 = vector.load %arg11[%c0_6, %c0_7, %c0_8] : memref<8x8x128xf32, #tpu.memory_space<vmem>>, vector<8x8x128xf32>
    tpu.vector_store %arg11[%c0_6, %c0_7, %c0_8], %8 {strides = array<i32>} : memref<8x8x128xf32, #tpu.memory_space<vmem>>, vector<8x8x128xf32>,
    %c0_9 = arith.constant 0 : index
    %c0_10 = arith.constant 0 : index
    %10 = vector.load %arg4[%c0_9, %c0_10] : memref<128x128xf32, #tpu.memory_space<vmem>>, vector<128x128xf32>
    %c0_11 = arith.constant 0 : index
    %c0_12 = arith.constant 0 : index
    %11 = vector.load %arg2[%c0_11, %c0_12] : memref<8x128xf32, #tpu.memory_space<vmem>>, vector<8x128xf32>
    %cst_13 = arith.constant dense<0.000000e+00> : vector<8x128xf32>
    %12 = tpu.matmul %11, %10, %cst_13 {dimension_numbers = #tpu.dot_dimension_numbers<[1], [0], [0], [1], [0, 0, 1, 1], [], []>} : vector<8x128xf32>, vector<128x128xf32>, vector<8x128xf32> -> vector<8x128xf32>
    %c0_14 = arith.constant 0 : index
    %c0_15 = arith.constant 0 : index
    %c0_16 = arith.constant 0 : index
    %13 = vector.load %arg11[%c0_14, %c0_15, %c0_16] : memref<8x8x128xf32, #tpu.memory_space<vmem>>, vector<1x8x128xf32>
    %14 = vector.shape_cast %13 : vector<1x8x128xf32> to vector<8x128xf32>
    %15 = arith.addf %12, %14 : vector<8x128xf32>
    %16 = math.tanh %15 : vector<8x128xf32>
    %c0_17 = arith.constant 0 : index
    %c0_18 = arith.constant 0 : index
    %c0_19 = arith.constant 0 : index
    %17 = vector.load %arg12[%c0_17, %c0_18, %c0_19] : memref<8x8x128xf32, #tpu.memory_space<vmem>>, vector<1x8x128xf32>
    %18 = vector.shape_cast %17 : vector<1x8x128xf32> to vector<8x128xf32>
    %19 = vector.shape_cast %16 : vector<8x128xf32> to vector<1x8x128xf32>
    tpu.vector_store %arg12[%c0_17, %c0_18, %c0_19], %19 {strides = array<i32>} : memref<8x8x128xf32, #tpu.memory_space<vmem>>, vector<1x8x128xf32>,
    %cst_20 = arith.constant dense<0.000000e+00> : vector<8x128xf32>
    %20 = tpu.matmul %16, %10, %cst_20 {dimension_numbers = #tpu.dot_dimension_numbers<[1], [0], [0], [1], [0, 0, 1, 1], [], []>} : vector<8x128xf32>, vector<128x128xf32>, vector<8x128xf32> -> vector<8x128xf32>
    %c1 = arith.constant 1 : index
    %c0_21 = arith.constant 0 : index
    %c0_22 = arith.constant 0 : index
    %21 = vector.load %arg11[%c1, %c0_21, %c0_22] : memref<8x8x128xf32, #tpu.memory_space<vmem>>, vector<1x8x128xf32>
    %22 = vector.shape_cast %21 : vector<1x8x128xf32> to vector<8x128xf32>
    %23 = arith.addf %20, %22 : vector<8x128xf32>
    %24 = math.tanh %23 : vector<8x128xf32>
    %c1_23 = arith.constant 1 : index
    %c0_24 = arith.constant 0 : index
    %c0_25 = arith.constant 0 : index
    %25 = vector.load %arg12[%c1_23, %c0_24, %c0_25] : memref<8x8x128xf32, #tpu.memory_space<vmem>>, vector<1x8x128xf32>
    %26 = vector.shape_cast %25 : vector<1x8x128xf32> to vector<8x128xf32>
    %27 = vector.shape_cast %24 : vector<8x128xf32> to vector<1x8x128xf32>
    tpu.vector_store %arg12[%c1_23, %c0_24, %c0_25], %27 {strides = array<i32>} : memref<8x8x128xf32, #tpu.memory_space<vmem>>, vector<1x8x128xf32>,
    %cst_26 = arith.constant dense<0.000000e+00> : vector<8x128xf32>
    %28 = tpu.matmul %24, %10, %cst_26 {dimension_numbers = #tpu.dot_dimension_numbers<[1], [0], [0], [1], [0, 0, 1, 1], [], []>} : vector<8x128xf32>, vector<128x128xf32>, vector<8x128xf32> -> vector<8x128xf32>
    %c2 = arith.constant 2 : index
    %c0_27 = arith.constant 0 : index
    %c0_28 = arith.constant 0 : index
    %29 = vector.load %arg11[%c2, %c0_27, %c0_28] : memref<8x8x128xf32, #tpu.memory_space<vmem>>, vector<1x8x128xf32>
    %30 = vector.shape_cast %29 : vector<1x8x128xf32> to vector<8x128xf32>
    %31 = arith.addf %28, %30 : vector<8x128xf32>
    %32 = math.tanh %31 : vector<8x128xf32>
    %c2_29 = arith.constant 2 : index
    %c0_30 = arith.constant 0 : index
    %c0_31 = arith.constant 0 : index
    %33 = vector.load %arg12[%c2_29, %c0_30, %c0_31] : memref<8x8x128xf32, #tpu.memory_space<vmem>>, vector<1x8x128xf32>
    %34 = vector.shape_cast %33 : vector<1x8x128xf32> to vector<8x128xf32>
    %35 = vector.shape_cast %32 : vector<8x128xf32> to vector<1x8x128xf32>
    tpu.vector_store %arg12[%c2_29, %c0_30, %c0_31], %35 {strides = array<i32>} : memref<8x8x128xf32, #tpu.memory_space<vmem>>, vector<1x8x128xf32>,
    %cst_32 = arith.constant dense<0.000000e+00> : vector<8x128xf32>
    %36 = tpu.matmul %32, %10, %cst_32 {dimension_numbers = #tpu.dot_dimension_numbers<[1], [0], [0], [1], [0, 0, 1, 1], [], []>} : vector<8x128xf32>, vector<128x128xf32>, vector<8x128xf32> -> vector<8x128xf32>
    %c3 = arith.constant 3 : index
    %c0_33 = arith.constant 0 : index
    %c0_34 = arith.constant 0 : index
    %37 = vector.load %arg11[%c3, %c0_33, %c0_34] : memref<8x8x128xf32, #tpu.memory_space<vmem>>, vector<1x8x128xf32>
    %38 = vector.shape_cast %37 : vector<1x8x128xf32> to vector<8x128xf32>
    %39 = arith.addf %36, %38 : vector<8x128xf32>
    %40 = math.tanh %39 : vector<8x128xf32>
    %c3_35 = arith.constant 3 : index
    %c0_36 = arith.constant 0 : index
    %c0_37 = arith.constant 0 : index
    %41 = vector.load %arg12[%c3_35, %c0_36, %c0_37] : memref<8x8x128xf32, #tpu.memory_space<vmem>>, vector<1x8x128xf32>
    %42 = vector.shape_cast %41 : vector<1x8x128xf32> to vector<8x128xf32>
    %43 = vector.shape_cast %40 : vector<8x128xf32> to vector<1x8x128xf32>
    tpu.vector_store %arg12[%c3_35, %c0_36, %c0_37], %43 {strides = array<i32>} : memref<8x8x128xf32, #tpu.memory_space<vmem>>, vector<1x8x128xf32>,
    %cst_38 = arith.constant dense<0.000000e+00> : vector<8x128xf32>
    %44 = tpu.matmul %40, %10, %cst_38 {dimension_numbers = #tpu.dot_dimension_numbers<[1], [0], [0], [1], [0, 0, 1, 1], [], []>} : vector<8x128xf32>, vector<128x128xf32>, vector<8x128xf32> -> vector<8x128xf32>
    %c4 = arith.constant 4 : index
    %c0_39 = arith.constant 0 : index
    %c0_40 = arith.constant 0 : index
    %45 = vector.load %arg11[%c4, %c0_39, %c0_40] : memref<8x8x128xf32, #tpu.memory_space<vmem>>, vector<1x8x128xf32>
    %46 = vector.shape_cast %45 : vector<1x8x128xf32> to vector<8x128xf32>
    %47 = arith.addf %44, %46 : vector<8x128xf32>
    %48 = math.tanh %47 : vector<8x128xf32>
    %c4_41 = arith.constant 4 : index
    %c0_42 = arith.constant 0 : index
    %c0_43 = arith.constant 0 : index
    %49 = vector.load %arg12[%c4_41, %c0_42, %c0_43] : memref<8x8x128xf32, #tpu.memory_space<vmem>>, vector<1x8x128xf32>
    %50 = vector.shape_cast %49 : vector<1x8x128xf32> to vector<8x128xf32>
    %51 = vector.shape_cast %48 : vector<8x128xf32> to vector<1x8x128xf32>
    tpu.vector_store %arg12[%c4_41, %c0_42, %c0_43], %51 {strides = array<i32>} : memref<8x8x128xf32, #tpu.memory_space<vmem>>, vector<1x8x128xf32>,
    %cst_44 = arith.constant dense<0.000000e+00> : vector<8x128xf32>
    %52 = tpu.matmul %48, %10, %cst_44 {dimension_numbers = #tpu.dot_dimension_numbers<[1], [0], [0], [1], [0, 0, 1, 1], [], []>} : vector<8x128xf32>, vector<128x128xf32>, vector<8x128xf32> -> vector<8x128xf32>
    %c5 = arith.constant 5 : index
    %c0_45 = arith.constant 0 : index
    %c0_46 = arith.constant 0 : index
    %53 = vector.load %arg11[%c5, %c0_45, %c0_46] : memref<8x8x128xf32, #tpu.memory_space<vmem>>, vector<1x8x128xf32>
    %54 = vector.shape_cast %53 : vector<1x8x128xf32> to vector<8x128xf32>
    %55 = arith.addf %52, %54 : vector<8x128xf32>
    %56 = math.tanh %55 : vector<8x128xf32>
    %c5_47 = arith.constant 5 : index
    %c0_48 = arith.constant 0 : index
    %c0_49 = arith.constant 0 : index
    %57 = vector.load %arg12[%c5_47, %c0_48, %c0_49] : memref<8x8x128xf32, #tpu.memory_space<vmem>>, vector<1x8x128xf32>
    %58 = vector.shape_cast %57 : vector<1x8x128xf32> to vector<8x128xf32>
    %59 = vector.shape_cast %56 : vector<8x128xf32> to vector<1x8x128xf32>
    tpu.vector_store %arg12[%c5_47, %c0_48, %c0_49], %59 {strides = array<i32>} : memref<8x8x128xf32, #tpu.memory_space<vmem>>, vector<1x8x128xf32>,
    %cst_50 = arith.constant dense<0.000000e+00> : vector<8x128xf32>
    %60 = tpu.matmul %56, %10, %cst_50 {dimension_numbers = #tpu.dot_dimension_numbers<[1], [0], [0], [1], [0, 0, 1, 1], [], []>} : vector<8x128xf32>, vector<128x128xf32>, vector<8x128xf32> -> vector<8x128xf32>
    %c6 = arith.constant 6 : index
    %c0_51 = arith.constant 0 : index
    %c0_52 = arith.constant 0 : index
    %61 = vector.load %arg11[%c6, %c0_51, %c0_52] : memref<8x8x128xf32, #tpu.memory_space<vmem>>, vector<1x8x128xf32>
    %62 = vector.shape_cast %61 : vector<1x8x128xf32> to vector<8x128xf32>
    %63 = arith.addf %60, %62 : vector<8x128xf32>
    %64 = math.tanh %63 : vector<8x128xf32>
    %c6_53 = arith.constant 6 : index
    %c0_54 = arith.constant 0 : index
    %c0_55 = arith.constant 0 : index
    %65 = vector.load %arg12[%c6_53, %c0_54, %c0_55] : memref<8x8x128xf32, #tpu.memory_space<vmem>>, vector<1x8x128xf32>
    %66 = vector.shape_cast %65 : vector<1x8x128xf32> to vector<8x128xf32>
    %67 = vector.shape_cast %64 : vector<8x128xf32> to vector<1x8x128xf32>
    tpu.vector_store %arg12[%c6_53, %c0_54, %c0_55], %67 {strides = array<i32>} : memref<8x8x128xf32, #tpu.memory_space<vmem>>, vector<1x8x128xf32>,
    %cst_56 = arith.constant dense<0.000000e+00> : vector<8x128xf32>
    %68 = tpu.matmul %64, %10, %cst_56 {dimension_numbers = #tpu.dot_dimension_numbers<[1], [0], [0], [1], [0, 0, 1, 1], [], []>} : vector<8x128xf32>, vector<128x128xf32>, vector<8x128xf32> -> vector<8x128xf32>
    %c7 = arith.constant 7 : index
    %c0_57 = arith.constant 0 : index
    %c0_58 = arith.constant 0 : index
    %69 = vector.load %arg11[%c7, %c0_57, %c0_58] : memref<8x8x128xf32, #tpu.memory_space<vmem>>, vector<1x8x128xf32>
    %70 = vector.shape_cast %69 : vector<1x8x128xf32> to vector<8x128xf32>
    %71 = arith.addf %68, %70 : vector<8x128xf32>
    %72 = math.tanh %71 : vector<8x128xf32>
    %c7_59 = arith.constant 7 : index
    %c0_60 = arith.constant 0 : index
    %c0_61 = arith.constant 0 : index
    %73 = vector.load %arg12[%c7_59, %c0_60, %c0_61] : memref<8x8x128xf32, #tpu.memory_space<vmem>>, vector<1x8x128xf32>
    %74 = vector.shape_cast %73 : vector<1x8x128xf32> to vector<8x128xf32>
    %75 = vector.shape_cast %72 : vector<8x128xf32> to vector<1x8x128xf32>
    tpu.vector_store %arg12[%c7_59, %c0_60, %c0_61], %75 {strides = array<i32>} : memref<8x8x128xf32, #tpu.memory_space<vmem>>, vector<1x8x128xf32>,
    %c0_62 = arith.constant 0 : index
    %c0_63 = arith.constant 0 : index
    %76 = vector.load %arg9[%c0_62, %c0_63] : memref<8x128xf32, #tpu.memory_space<vmem>>, vector<8x128xf32>
    tpu.vector_store %arg9[%c0_62, %c0_63], %72 {strides = array<i32>} : memref<8x128xf32, #tpu.memory_space<vmem>>, vector<8x128xf32>,
    %c0_64 = arith.constant 0 : index
    %c0_65 = arith.constant 0 : index
    %c0_66 = arith.constant 0 : index
    %77 = vector.load %arg12[%c0_64, %c0_65, %c0_66] : memref<8x8x128xf32, #tpu.memory_space<vmem>>, vector<8x8x128xf32>
    %78 = tpu.transpose %77, [1, 0, 2] : vector<8x8x128xf32> -> vector<8x8x128xf32>
    %c0_67 = arith.constant 0 : index
    %c0_68 = arith.constant 0 : index
    %c0_69 = arith.constant 0 : index
    %79 = vector.load %arg8[%c0_67, %c0_68, %c0_69] : memref<8x8x128xf32, #tpu.memory_space<vmem>>, vector<8x8x128xf32>
    tpu.vector_store %arg8[%c0_67, %c0_68, %c0_69], %78 {strides = array<i32>} : memref<8x8x128xf32, #tpu.memory_space<vmem>>, vector<8x8x128xf32>,
    %80 = vector.shape_cast %78 : vector<8x8x128xf32> to vector<64x128xf32>
    %c0_70 = arith.constant 0 : index
    %c0_71 = arith.constant 0 : index
    %81 = vector.load %arg6[%c0_70, %c0_71] : memref<128x128xf32, #tpu.memory_space<vmem>>, vector<128x128xf32>
    %cst_72 = arith.constant dense<0.000000e+00> : vector<64x128xf32>
    %82 = tpu.matmul %80, %81, %cst_72 {dimension_numbers = #tpu.dot_dimension_numbers<[1], [0], [0], [1], [0, 0, 1, 1], [], []>} : vector<64x128xf32>, vector<128x128xf32>, vector<64x128xf32> -> vector<64x128xf32>
    %c0_73 = arith.constant 0 : index
    %c0_74 = arith.constant 0 : index
    %83 = vector.load %arg7[%c0_73, %c0_74] : memref<1x128xf32, #tpu.memory_space<vmem>>, vector<1x128xf32>
    %84 = vector.broadcast %83 : vector<1x128xf32> to vector<64x128xf32>
    %85 = arith.addf %82, %84 : vector<64x128xf32>
    %86 = tpu.iota {dimensions = array<i32: 1>} : vector<64x128xi32>
    %c3_i32 = arith.constant 3 : i32
    %87 = vector.broadcast %c3_i32 : i32 to vector<64x128xi32>
    %88 = arith.cmpi slt, %86, %87 : vector<64x128xi32>
    %c3_i32_75 = arith.constant 3 : i32
    %89 = vector.broadcast %c3_i32_75 : i32 to vector<64x128xi32>
    %90 = arith.cmpi sge, %86, %89 : vector<64x128xi32>
    %c15_i32 = arith.constant 15 : i32
    %91 = vector.broadcast %c15_i32 : i32 to vector<64x128xi32>
    %92 = arith.cmpi slt, %86, %91 : vector<64x128xi32>
    %93 = arith.andi %90, %92 : vector<64x128xi1>
    %c15_i32_76 = arith.constant 15 : i32
    %94 = vector.broadcast %c15_i32_76 : i32 to vector<64x128xi32>
    %95 = arith.cmpi sge, %86, %94 : vector<64x128xi32>
    %c27_i32 = arith.constant 27 : i32
    %96 = vector.broadcast %c27_i32 : i32 to vector<64x128xi32>
    %97 = arith.cmpi slt, %86, %96 : vector<64x128xi32>
    %98 = arith.andi %95, %97 : vector<64x128xi1>
    %cst_77 = arith.constant -3.40282347E+38 : f32
    %99 = vector.broadcast %cst_77 : f32 to vector<64x128xf32>
    %100 = arith.select %88, %85, %99 : vector<64x128xi1>, vector<64x128xf32>
    %cst_78 = arith.constant dense<0xFF800000> : vector<64xf32>
    %101 = vector.multi_reduction <maximumf>, %100, %cst_78 [1] : vector<64x128xf32> to vector<64xf32>
    %102 = vector.shape_cast %101 : vector<64xf32> to vector<64x1xf32>
    %103 = vector.broadcast %102 : vector<64x1xf32> to vector<64x128xf32>
    %104 = arith.subf %85, %103 : vector<64x128xf32>
    %105 = arith.select %88, %104, %85 : vector<64x128xi1>, vector<64x128xf32>
    %106 = math.exp %105 : vector<64x128xf32>
    %cst_79 = arith.constant 0.000000e+00 : f32
    %107 = vector.broadcast %cst_79 : f32 to vector<64x128xf32>
    %108 = arith.select %88, %106, %107 : vector<64x128xi1>, vector<64x128xf32>
    %cst_80 = arith.constant dense<0.000000e+00> : vector<64xf32>
    %109 = vector.multi_reduction <add>, %108, %cst_80 [1] : vector<64x128xf32> to vector<64xf32>
    %110 = vector.shape_cast %109 : vector<64xf32> to vector<64x1xf32>
    %111 = vector.broadcast %110 : vector<64x1xf32> to vector<64x128xf32>
    %112 = arith.divf %108, %111 : vector<64x128xf32>
    %cst_81 = arith.constant 0.000000e+00 : f32
    %113 = vector.broadcast %cst_81 : f32 to vector<64x128xf32>
    %114 = arith.select %98, %106, %113 : vector<64x128xi1>, vector<64x128xf32>
    %115 = arith.select %93, %85, %114 : vector<64x128xi1>, vector<64x128xf32>
    %116 = arith.select %88, %112, %115 : vector<64x128xi1>, vector<64x128xf32>
    %117 = vector.shape_cast %116 : vector<64x128xf32> to vector<8x8x128xf32>
    %c0_82 = arith.constant 0 : index
    %c0_83 = arith.constant 0 : index
    %c0_84 = arith.constant 0 : index
    %118 = vector.load %arg10[%c0_82, %c0_83, %c0_84] : memref<8x8x128xf32, #tpu.memory_space<vmem>>, vector<8x8x128xf32>
    tpu.vector_store %arg10[%c0_82, %c0_83, %c0_84], %117 {strides = array<i32>} : memref<8x8x128xf32, #tpu.memory_space<vmem>>, vector<8x8x128xf32>,
    return
  }
  func.func @transform_0(%arg0: i32) -> (i32, i32, i32) {
    %c0_i32 = arith.constant 0 : i32
    %c0_i32_0 = arith.constant 0 : i32
    %c0_i32_1 = arith.constant 0 : i32
    return %arg0, %c0_i32, %c0_i32_0 : i32, i32, i32
  }
  func.func @transform_1(%arg0: i32) -> (i32, i32) {
    %c0_i32 = arith.constant 0 : i32
    %c0_i32_0 = arith.constant 0 : i32
    return %arg0, %c0_i32 : i32, i32
  }
  func.func @transform_2(%arg0: i32) -> (i32, i32) {
    %c0_i32 = arith.constant 0 : i32
    %c0_i32_0 = arith.constant 0 : i32
    %c0_i32_1 = arith.constant 0 : i32
    return %c0_i32, %c0_i32_0 : i32, i32
  }
  func.func @transform_3(%arg0: i32) -> (i32, i32) {
    %c0_i32 = arith.constant 0 : i32
    %c0_i32_0 = arith.constant 0 : i32
    %c0_i32_1 = arith.constant 0 : i32
    return %c0_i32, %c0_i32_0 : i32, i32
  }
  func.func @transform_4(%arg0: i32) -> (i32, i32) {
    %c0_i32 = arith.constant 0 : i32
    %c0_i32_0 = arith.constant 0 : i32
    %c0_i32_1 = arith.constant 0 : i32
    return %c0_i32, %c0_i32_0 : i32, i32
  }
  func.func @transform_5(%arg0: i32) -> (i32, i32) {
    %c0_i32 = arith.constant 0 : i32
    %c0_i32_0 = arith.constant 0 : i32
    %c0_i32_1 = arith.constant 0 : i32
    return %c0_i32, %c0_i32_0 : i32, i32
  }
  func.func @transform_6(%arg0: i32) -> (i32, i32) {
    %c0_i32 = arith.constant 0 : i32
    %c0_i32_0 = arith.constant 0 : i32
    %c0_i32_1 = arith.constant 0 : i32
    return %c0_i32, %c0_i32_0 : i32, i32
  }
  func.func @transform_7(%arg0: i32) -> (i32, i32, i32) {
    %c0_i32 = arith.constant 0 : i32
    %c0_i32_0 = arith.constant 0 : i32
    %c0_i32_1 = arith.constant 0 : i32
    return %arg0, %c0_i32, %c0_i32_0 : i32, i32, i32
  }
  func.func @transform_8(%arg0: i32) -> (i32, i32) {
    %c0_i32 = arith.constant 0 : i32
    %c0_i32_0 = arith.constant 0 : i32
    return %arg0, %c0_i32 : i32, i32
  }
  func.func @transform_9(%arg0: i32) -> (i32, i32, i32) {
    %c0_i32 = arith.constant 0 : i32
    %c0_i32_0 = arith.constant 0 : i32
    %c0_i32_1 = arith.constant 0 : i32
    return %arg0, %c0_i32, %c0_i32_0 : i32, i32, i32
  }
}

</mosaic_0001>

<bundles_post_ra>
// kernel: mdnrnn_forward.1
= control target key start
LH: loop header
LB: loop body
LE: loop exit
PB: predicated region body
PF: predicated region fallthrough
CT: control target
= control target key end

     0   :  { %v1960_v2 = vmov 0.0   ;;  %vm1961_vm0 = vmmov 0   ;;  %v1962_v42 = vmov 1983009808   ;;  %v170_v44 = vlaneseq  ;;  %s2857_s2 = inlined_call_operand.vmem [shape: f32[128,128], index: 2, kind: input, shape index: {}]   ;;  %s2858_s3 = inlined_call_operand.vmem [shape: f32[128,128], index: 3, kind: input, shape index: {}]   ;;  %s2859_s0 = inlined_call_operand.vmem [shape: f32[8,8,128], index: 0, kind: input, shape index: {}]   ;;  %s2860_s1 = inlined_call_operand.vmem [shape: f32[8,128], index: 1, kind: input, shape index: {}]   ;;  %s2861_s4 = inlined_call_operand.vmem [shape: f32[1,128], index: 4, kind: input, shape index: {}]   ;;  %s2862_s5 = inlined_call_operand.vmem [shape: f32[128,128], index: 5, kind: input, shape index: {}]   ;;  %s2863_s8 = inlined_call_operand.vmem [shape: f32[8,128], index: 8, kind: output, shape index: {1}]   ;;  %s2864_s7 = inlined_call_operand.vmem [shape: f32[8,8,128], index: 7, kind: output, shape index: {0}]   ;;  %s2865_s6 = inlined_call_operand.vmem [shape: f32[1,128], index: 6, kind: input, shape index: {}]   ;;  %s2866_s9 = inlined_call_operand.vmem [shape: f32[8,8,128], index: 9, kind: output, shape index: {2}]  }
   0x1   :  { %v53_v0 = vld [vmem:[%s2857_s2 + $0x78] sm:$0xff]  ;;  %v52_v1 = vld [vmem:[%s2857_s2 + $0x70] sm:$0xff]  ;;  %1584 = vmatprep.subr.mxu1 %v1960_v2  ;;  %1616 = vmatprep.mubr.msk.f32.mxu1 %vm1961_vm0, %v1960_v2  ;;  %v51_v3 = vld [vmem:[%s2857_s2 + $0x68] sm:$0xff]  ;;  %v168_v43 = vunpack.c.l.s4 %v1962_v42 }
   0x2   :  { %1540 = vmatprep.subr.mxu0 %v53_v0  ;;  %v50_v4 = vld [vmem:[%s2857_s2 + $0x60] sm:$0xff]  ;;  %v2032_v5 = vld [vmem:[%s2858_s3 + $0x78] sm:$0xff]  ;;  %v2038_v6 = vld [vmem:[%s2858_s3 + $0x70] sm:$0xff]  ;;  %v171_v49 = vshrl.u32 %v170_v44, 7 }
   0x3   :  { %1541 = vmatpush3.msra.mxu0 %v53_v0  ;;  %1585 = vmatpush3.msra.mxu1 %v2032_v5  ;;  %v49_v7 = vld [vmem:[%s2857_s2 + $0x58] sm:$0xff]  ;;  %v2047_v8 = vld [vmem:[%s2858_s3 + $0x68] sm:$0xff]  ;;  %v48_v9 = vld [vmem:[%s2857_s2 + $0x50] sm:$0xff]  ;;  %v169_v48 = vunpack.c.0.s8 %v168_v43 }
   0x4   :  { %1542 = vmatprep.subr.mxu0 %v52_v1  ;;  %1586 = vmatprep.subr.mxu1 %v1960_v2  ;;  %v30_v10 = vld [vmem:[%s2859_s0] sm:$0xff]  ;;  %v47_v12 = vld [vmem:[%s2857_s2 + $0x48] sm:$0xff]  ;;  %v2070_v13 = vld [vmem:[%s2858_s3 + $0x58] sm:$0xff] }
   0x5   :  { %1543 = vmatpush3.msra.mxu0 %v52_v1  ;;  %1587 = vmatpush3.msra.mxu1 %v2038_v6  ;;  %v2061_v11 = vld [vmem:[%s2858_s3 + $0x60] sm:$0xff]  ;;  %v2080_v15 = vld [vmem:[%s2858_s3 + $0x50] sm:$0xff]  ;;  %v45_v16 = vld [vmem:[%s2857_s2 + $0x38] sm:$0xff]  ;;  %v2277_v54 = vsub.s32 %v169_v48, %v171_v49  ;;  %v1963_v1 = vmov 1934713408  }
   0x6   :  { %1544 = vmatprep.subr.mxu0 %v51_v3  ;;  %1588 = vmatprep.subr.mxu1 %v1960_v2  ;;  %v46_v14 = vld [vmem:[%s2857_s2 + $0x40] sm:$0xff]  ;;  %v2090_v17 = vld [vmem:[%s2858_s3 + $0x48] sm:$0xff]  ;;  %v44_v18 = vld [vmem:[%s2857_s2 + $0x30] sm:$0xff] }
   0x7   :  { %1545 = vmatpush3.msra.mxu0 %v51_v3  ;;  %1589 = vmatpush3.msra.mxu1 %v2047_v8  ;;  %v2100_v19 = vld [vmem:[%s2858_s3 + $0x40] sm:$0xff]  ;;  %v43_v20 = vld [vmem:[%s2857_s2 + $0x28] sm:$0xff]  ;;  %v2110_v21 = vld [vmem:[%s2858_s3 + $0x38] sm:$0xff]  ;;  %v232_v3 = vunpack.c.l.s4 %v1963_v1 }
   0x8   :  { %1546 = vmatprep.subr.mxu0 %v50_v4  ;;  %1590 = vmatprep.subr.mxu1 %v1960_v2  ;;  %v42_v22 = vld [vmem:[%s2857_s2 + $0x20] sm:$0xff]  ;;  %v2120_v23 = vld [vmem:[%s2858_s3 + $0x30] sm:$0xff]  ;;  %v41_v24 = vld [vmem:[%s2857_s2 + $0x18] sm:$0xff] }
   0x9   :  { %1547 = vmatpush3.msra.mxu0 %v50_v4  ;;  %1572 = vmatprep.mubr.f32.mxu0 %v30_v10  ;;  %v2130_v25 = vld [vmem:[%s2858_s3 + $0x28] sm:$0xff]  ;;  %v40_v26 = vld [vmem:[%s2857_s2 + $0x10] sm:$0xff]  ;;  %v2140_v27 = vld [vmem:[%s2858_s3 + $0x20] sm:$0xff] }
   0xa   :  { %1548 = vmatprep.subr.mxu0 %v49_v7  ;;  %1591 = vmatpush3.msra.mxu1 %v2061_v11  ;;  %v39_v28 = vld [vmem:[%s2857_s2 + $0x8] sm:$0xff]  ;;  %v2150_v29 = vld [vmem:[%s2858_s3 + $0x18] sm:$0xff]  ;;  %v38_v30 = vld [vmem:[%s2857_s2] sm:$0xff] }
   0xb   :  { %1549 = vmatpush3.msra.mxu0 %v49_v7  ;;  %1592 = vmatprep.subr.mxu1 %v1960_v2  ;;  %v2160_v31 = vld [vmem:[%s2858_s3 + $0x10] sm:$0xff]  ;;  %v31_v32 = vld [vmem:[%s2859_s0 + $0x8] sm:$0xff]  ;;  %v2180_v35 = vld [vmem:[%s2858_s3] sm:$0xff] }
   0xc   :  { %1550 = vmatprep.subr.mxu0 %v48_v9  ;;  %1593 = vmatpush3.msra.mxu1 %v2070_v13  ;;  %v32_v33 = vld [vmem:[%s2859_s0 + $0x10] sm:$0xff]  ;;  %v2173_v34 = vld [vmem:[%s2858_s3 + $0x8] sm:$0xff]  ;;  %v33_v36 = vld [vmem:[%s2859_s0 + $0x18] sm:$0xff] }
   0xd   :  { %1551 = vmatpush3.msra.mxu0 %v48_v9  ;;  %1594 = vmatprep.subr.mxu1 %v1960_v2  ;;  %v325_v37 = vld [vmem:[%s2860_s1] sm:$0xff]  ;;  %v35_v39 = vld [vmem:[%s2859_s0 + $0x28] sm:$0xff]  ;;  %v36_v40 = vld [vmem:[%s2859_s0 + $0x30] sm:$0xff] }
   0xe   :  { %1552 = vmatprep.subr.mxu0 %v47_v12  ;;  %1595 = vmatpush3.msra.mxu1 %v2080_v15  ;;  %v34_v38 = vld [vmem:[%s2859_s0 + $0x20] sm:$0xff]  ;;  %v37_v41 = vld [vmem:[%s2859_s0 + $0x38] sm:$0xff] }
   0xf   :  { %1553 = vmatpush3.msra.mxu0 %v47_v12  ;;  %1596 = vmatprep.subr.mxu1 %v1960_v2  ;;  %v1354_v46 = vld [vmem:[%s2861_s4] ss:$0 sm:$0xff] }
  0x10   :  { %1554 = vmatprep.subr.mxu0 %v46_v14  ;;  %1597 = vmatpush3.msra.mxu1 %v2090_v17 }
  0x11   :  { %1555 = vmatpush3.msra.mxu0 %v46_v14  ;;  %1598 = vmatprep.subr.mxu1 %v1960_v2 }
  0x12   :  { %1556 = vmatprep.subr.mxu0 %v45_v16  ;;  %1599 = vmatpush3.msra.mxu1 %v2100_v19 }
  0x13   :  { %1557 = vmatpush3.msra.mxu0 %v45_v16  ;;  %1600 = vmatprep.subr.mxu1 %v1960_v2 }
  0x14   :  { %1558 = vmatprep.subr.mxu0 %v44_v18  ;;  %1601 = vmatpush3.msra.mxu1 %v2110_v21 }
  0x15   :  { %1559 = vmatpush3.msra.mxu0 %v44_v18  ;;  %1602 = vmatprep.subr.mxu1 %v1960_v2 }
  0x16   :  { %1560 = vmatprep.subr.mxu0 %v43_v20  ;;  %1603 = vmatpush3.msra.mxu1 %v2120_v23 }
  0x17   :  { %1561 = vmatpush3.msra.mxu0 %v43_v20  ;;  %1604 = vmatprep.subr.mxu1 %v1960_v2 }
  0x18   :  { %1562 = vmatprep.subr.mxu0 %v42_v22  ;;  %1605 = vmatpush3.msra.mxu1 %v2130_v25 }
  0x19   :  { %1563 = vmatpush3.msra.mxu0 %v42_v22  ;;  %1606 = vmatprep.subr.mxu1 %v1960_v2 }
  0x1a   :  { %1564 = vmatprep.subr.mxu0 %v41_v24  ;;  %1607 = vmatpush3.msra.mxu1 %v2140_v27 }
  0x1b   :  { %1565 = vmatpush3.msra.mxu0 %v41_v24  ;;  %1608 = vmatprep.subr.mxu1 %v1960_v2  ;;  %v233_v24 = vunpack.c.0.s8 %v232_v3 }
  0x1c   :  { %1566 = vmatprep.subr.mxu0 %v40_v26  ;;  %1609 = vmatpush3.msra.mxu1 %v2150_v29 }
  0x1d   :  { %1567 = vmatpush3.msra.mxu0 %v40_v26  ;;  %1610 = vmatprep.subr.mxu1 %v1960_v2 }
  0x1e   :  { %1568 = vmatprep.subr.mxu0 %v39_v28  ;;  %1611 = vmatpush3.msra.mxu1 %v2160_v31 }
  0x1f   :  { %1569 = vmatpush3.msra.mxu0 %v39_v28  ;;  %1612 = vmatprep.subr.mxu1 %v1960_v2 }
  0x20   :  { %1570 = vmatprep.subr.mxu0 %v38_v30  ;;  %1613 = vmatpush3.msra.mxu1 %v2173_v34 }
  0x21   :  { %1571 = vmatpush3.msra.mxu0 %v38_v30  ;;  %1614 = vmatprep.subr.mxu1 %v1960_v2 }
  0x22   :  { %1573 = vmatmul.mubr.f32.vlgmr.msra.gmra.mxu0 %v31_v32  ;;  %1619 = vmatprep.subr.mxu0 %v1960_v2 }
  0x23   :  { %1575 = vmatprep.mubr.f32.mxu0 %v32_v33  ;;  %1615 = vmatpush3.msra.mxu1 %v2180_v35 }
  0x24   :  { %1620 = vmatpush3.msra.mxu0 %v2032_v5  ;;  %1617 = vmatmul.mubr.f32.vlgmr.msra.gmra.mxu1 %v325_v37 }
  0x25   :  { %1621 = vmatprep.subr.mxu0 %v1960_v2  ;;  %1654 = vmatprep.subr.mxu1 %v1960_v2 }
  0x26   :  { %1576 = vmatmul.mubr.f32.gmra.mxu0 %v33_v36  ;;  %1655 = vmatpush3.msra.mxu1 %v2032_v5 }
  0x27   :  { %1578 = vmatprep.mubr.f32.mxu0 %v34_v38  ;;  %1622 = vmatpush3.msra.mxu0 %v2038_v6 }
  0x28   :  { %1623 = vmatprep.subr.mxu0 %v1960_v2  ;;  %1656 = vmatprep.subr.mxu1 %v1960_v2 }
  0x29   :  { %1624 = vmatpush3.msra.mxu0 %v2047_v8  ;;  %1657 = vmatpush3.msra.mxu1 %v2038_v6 }
  0x2a   :  { %1579 = vmatmul.mubr.f32.gmra.mxu0 %v35_v39  ;;  %1625 = vmatprep.subr.mxu0 %v1960_v2  ;;  %v2283_v39 = vsub.s32 %v233_v24, %v171_v49 }
  0x2b   :  { %1581 = vmatprep.mubr.f32.mxu0 %v36_v40  ;;  %1626 = vmatpush3.msra.mxu0 %v2061_v11 }
  0x2c   :  { %1658 = vmatprep.subr.mxu1 %v1960_v2  ;;  %1627 = vmatprep.subr.mxu0 %v1960_v2 }
  0x2d   :  { %1628 = vmatpush3.msra.mxu0 %v2070_v13  ;;  %1659 = vmatpush3.msra.mxu1 %v2047_v8 }
  0x2e   :  { %1582 = vmatmul.mubr.f32.gmra.mxu0 %v37_v41  ;;  %1629 = vmatprep.subr.mxu0 %v1960_v2 }
  0x2f   :  { %1651 = vmatprep.mubr.msk.f32.mxu0 %vm1961_vm0, %v1960_v2  ;;  %1630 = vmatpush3.msra.mxu0 %v2080_v15 }
  0x30   :  { %1660 = vmatprep.subr.mxu1 %v1960_v2  ;;  %1631 = vmatprep.subr.mxu0 %v1960_v2 }
  0x31   :  { %1661 = vmatpush3.msra.mxu1 %v2061_v11  ;;  %1632 = vmatpush3.msra.mxu0 %v2090_v17 }
  0x32   :  { %1662 = vmatprep.subr.mxu1 %v1960_v2  ;;  %1633 = vmatprep.subr.mxu0 %v1960_v2 }
  0x33   :  { %1663 = vmatpush3.msra.mxu1 %v2070_v13  ;;  %1634 = vmatpush3.msra.mxu0 %v2100_v19 }
  0x34   :  { %1664 = vmatprep.subr.mxu1 %v1960_v2  ;;  %1635 = vmatprep.subr.mxu0 %v1960_v2 }
  0x35   :  { %1665 = vmatpush3.msra.mxu1 %v2080_v15  ;;  %1636 = vmatpush3.msra.mxu0 %v2110_v21 }
  0x36   :  { %1666 = vmatprep.subr.mxu1 %v1960_v2  ;;  %1637 = vmatprep.subr.mxu0 %v1960_v2 }
  0x37   :  { %1667 = vmatpush3.msra.mxu1 %v2090_v17  ;;  %1638 = vmatpush3.msra.mxu0 %v2120_v23 }
  0x38   :  { %1668 = vmatprep.subr.mxu1 %v1960_v2  ;;  %1639 = vmatprep.subr.mxu0 %v1960_v2 }
  0x39   :  { %1669 = vmatpush3.msra.mxu1 %v2100_v19  ;;  %1640 = vmatpush3.msra.mxu0 %v2130_v25 }
  0x3a   :  { %1670 = vmatprep.subr.mxu1 %v1960_v2  ;;  %1641 = vmatprep.subr.mxu0 %v1960_v2 }
  0x3b   :  { %1671 = vmatpush3.msra.mxu1 %v2110_v21  ;;  %1642 = vmatpush3.msra.mxu0 %v2140_v27 }
  0x3c   :  { %1672 = vmatprep.subr.mxu1 %v1960_v2  ;;  %1643 = vmatprep.subr.mxu0 %v1960_v2 }
  0x3d   :  { %1673 = vmatpush3.msra.mxu1 %v2120_v23  ;;  %1644 = vmatpush3.msra.mxu0 %v2150_v29 }
  0x3e   :  { %1674 = vmatprep.subr.mxu1 %v1960_v2  ;;  %1645 = vmatprep.subr.mxu0 %v1960_v2 }
  0x3f   :  { %1675 = vmatpush3.msra.mxu1 %v2130_v25  ;;  %1646 = vmatpush3.msra.mxu0 %v2160_v31 }
  0x40   :  { %1676 = vmatprep.subr.mxu1 %v1960_v2  ;;  %1647 = vmatprep.subr.mxu0 %v1960_v2 }
  0x41   :  { %1677 = vmatpush3.msra.mxu1 %v2140_v27  ;;  %1648 = vmatpush3.msra.mxu0 %v2173_v34 }
  0x42   :  { %1678 = vmatprep.subr.mxu1 %v1960_v2  ;;  %1649 = vmatprep.subr.mxu0 %v1960_v2 }
  0x43   :  { %1679 = vmatpush3.msra.mxu1 %v2150_v29  ;;  %1650 = vmatpush3.msra.mxu0 %v2180_v35 }
  0x44   :  { %1680 = vmatprep.subr.mxu1 %v1960_v2  ;;  %1686 = vmatprep.mubr.msk.f32.mxu1 %vm1961_vm0, %v1960_v2 }
  0x45   :  { %1681 = vmatpush3.msra.mxu1 %v2160_v31  ;;  %1689 = vmatprep.subr.mxu0 %v1960_v2 }
  0x46   :  { %1682 = vmatprep.subr.mxu1 %v1960_v2 }
  0x47   :  { %1683 = vmatpush3.msra.mxu1 %v2173_v34 }
  0x48   :  { %1684 = vmatprep.subr.mxu1 %v1960_v2 }
  0x49   :  { %1685 = vmatpush3.msra.mxu1 %v2180_v35 }
  0x4a   :  { %1724 = vmatprep.subr.mxu1 %v1960_v2 }
  0xe2   :  { %v1574_v45 = vpop.f32.mrf.mxu0 }
  0xe3   :  { %v132_v52 = vadd.f32 %v1574_v45, %v1354_v46 }
  0xe4   :  { %v126_v47 = vpop.f32.mrf.mxu0  ;;  %v393_v51 = vpop.f32.mrf.mxu1 }
  0xe5   :  { %v127_v57 = vadd.f32 %v1354_v46, %v126_v47 }
  0xe6   :  { %v1577_v50 = vpop.f32.mrf.mxu0  ;;  %v1618_v56 = vpop.f32.mrf.mxu1 }
  0xe7   :  { %v142_v53 = vadd.f32 %v1577_v50, %v1354_v46 }
  0xe8   :  { %v136_v55 = vpop.f32.mrf.mxu0 }
  0xe9   :  { %v181_v58 = vcombine.low %v132_v52, %v142_v53  ;;  %v182_v59 = vcombine.high %v132_v52, %v142_v53  ;;  %v137_v60 = vadd.f32 %v1354_v46, %v136_v55 }
  0xea   :  { %v1580_v61 = vpop.f32.mrf.mxu0 }
  0xeb   :  { %v165_v62 = vcombine.low %v127_v57, %v137_v60  ;;  %v166_v63 = vcombine.high %v127_v57, %v137_v60  ;;  %v189_v4 = vrot.slane %v181_v58, %v2277_v54  ;;  %v196_v7 = vrot.slane %v182_v59, %v2277_v54 }
  0xec   :  { %v146_v0 = vpop.f32.mrf.mxu0  ;;  %v152_v14 = vadd.f32 %v1580_v61, %v1354_v46 }
  0xed   :  { %v173_v9 = vrot.slane %v165_v62, %v2277_v54  ;;  %v180_v10 = vrot.slane %v166_v63, %v2277_v54  ;;  %v147_v28 = vadd.f32 %v1354_v46, %v146_v0 }
  0xee   :  { %v1583_v12 = vpop.f32.mrf.mxu0 }
  0xef   :  { %v162_v16 = vadd.f32 %v1583_v12, %v1354_v46  ;;  %v230_v18 = vcombine.high %v173_v9, %v189_v4  ;;  %v245_v20 = vcombine.low %v180_v10, %v196_v7  ;;  %v246_v26 = vcombine.high %v180_v10, %v196_v7 }
  0xf0   :  { %v156_v22 = vpop.f32.mrf.mxu0  ;;  %v229_v38 = vcombine.low %v173_v9, %v189_v4 }
  0xf1   :  { %v213_v30 = vcombine.low %v152_v14, %v162_v16  ;;  %v214_v32 = vcombine.high %v152_v14, %v162_v16  ;;  %v157_v33 = vadd.f32 %v1354_v46, %v156_v22  ;;  %v2291_v46 = vrot.slane %v230_v18, %v2283_v39 }
  0xf2   :  { %v237_v52 = vrot.slane %v229_v38, %v2283_v39  ;;  %v2304_v57 = vrot.slane %v245_v20, %v2283_v39  ;;  %v2307_v58 = vrot.slane %v246_v26, %v2283_v39 }
  0xf3   :  { %v197_v36 = vcombine.low %v147_v28, %v157_v33  ;;  %v198_v37 = vcombine.high %v147_v28, %v157_v33  ;;  %v221_v40 = vrot.slane %v213_v30, %v2277_v54  ;;  %v228_v41 = vrot.slane %v214_v32, %v2277_v54 }
  0xf5   :  { %v205_v42 = vrot.slane %v197_v36, %v2277_v54  ;;  %v212_v43 = vrot.slane %v198_v37, %v2277_v54 }
  0xf7   :  { %v261_v45 = vcombine.low %v205_v42, %v221_v40  ;;  %v262_v47 = vcombine.high %v205_v42, %v221_v40  ;;  %v277_v48 = vcombine.low %v212_v43, %v228_v41  ;;  %v278_v50 = vcombine.high %v212_v43, %v228_v41 }
  0xf9   :  { %v269_v49 = vrot.slane %v261_v45, %v2283_v39  ;;  %v2295_v53 = vrot.slane %v262_v47, %v2283_v39  ;;  %v2298_v55 = vrot.slane %v277_v48, %v2283_v39  ;;  %v2301_v56 = vrot.slane %v278_v50, %v2283_v39 }
  0xfb   :  { %v293_v59 = vcombine.low %v237_v52, %v269_v49  ;;  %v294_v60 = vcombine.high %v237_v52, %v269_v49  ;;  %v295_v61 = vcombine.low %v2291_v46, %v2295_v53  ;;  %v296_v62 = vcombine.high %v2291_v46, %v2295_v53  ;;  %v1083_v49 = vld [vmem:[%s2862_s5 + $0x30] sm:$0xff]  ;;  %v1082_v53 = vld [vmem:[%s2862_s5 + $0x28] sm:$0xff] }
  0xfc   :  { %v297_v63 = vcombine.low %v2304_v57, %v2298_v55  ;;  %v298_v0 = vcombine.high %v2304_v57, %v2298_v55  ;;  %v299_v1 = vcombine.low %v2307_v58, %v2301_v56  ;;  %v300_v3 = vcombine.high %v2307_v58, %v2301_v56  ;;  %v1081_v55 = vld [vmem:[%s2862_s5 + $0x20] sm:$0xff]  ;;  %v1080_v57 = vld [vmem:[%s2862_s5 + $0x18] sm:$0xff] }
  0xfd   :  { %v394_v4 = vadd.f32 %v393_v51, %v293_v59  ;;  %v1079_v59 = vld [vmem:[%s2862_s5 + $0x10] sm:$0xff] }
  0xff   :  { %1912 = vtanh.f32 %v394_v4 }
 0x10c   :  { %v2321_v7 = vpop.eup %1912 }
 0x10d   :  { %1652 = vmatmul.mubr.f32.vlgmr.msra.gmra.mxu0 %v2321_v7 }
 0x10e   :  { %1690 = vmatpush3.msra.mxu0 %v2032_v5  ;;  %1721 = vmatprep.mubr.msk.f32.mxu0 %vm1961_vm0, %v1960_v2 }
 0x10f   :  { %1691 = vmatprep.subr.mxu0 %v1960_v2 }
 0x110   :  { %1692 = vmatpush3.msra.mxu0 %v2038_v6 }
 0x111   :  { %1693 = vmatprep.subr.mxu0 %v1960_v2 }
 0x112   :  { %1694 = vmatpush3.msra.mxu0 %v2047_v8 }
 0x113   :  { %1695 = vmatprep.subr.mxu0 %v1960_v2 }
 0x114   :  { %1696 = vmatpush3.msra.mxu0 %v2061_v11 }
 0x115   :  { %1697 = vmatprep.subr.mxu0 %v1960_v2 }
 0x116   :  { %1698 = vmatpush3.msra.mxu0 %v2070_v13 }
 0x117   :  { %1699 = vmatprep.subr.mxu0 %v1960_v2 }
 0x118   :  { %1700 = vmatpush3.msra.mxu0 %v2080_v15 }
 0x119   :  { %1701 = vmatprep.subr.mxu0 %v1960_v2 }
 0x11a   :  { %1702 = vmatpush3.msra.mxu0 %v2090_v17 }
 0x11b   :  { %1703 = vmatprep.subr.mxu0 %v1960_v2 }
 0x11c   :  { %1704 = vmatpush3.msra.mxu0 %v2100_v19 }
 0x11d   :  { %1705 = vmatprep.subr.mxu0 %v1960_v2 }
 0x11e   :  { %1706 = vmatpush3.msra.mxu0 %v2110_v21 }
 0x11f   :  { %1707 = vmatprep.subr.mxu0 %v1960_v2 }
 0x120   :  { %1708 = vmatpush3.msra.mxu0 %v2120_v23 }
 0x121   :  { %1709 = vmatprep.subr.mxu0 %v1960_v2 }
 0x122   :  { %1710 = vmatpush3.msra.mxu0 %v2130_v25 }
 0x123   :  { %1711 = vmatprep.subr.mxu0 %v1960_v2 }
 0x124   :  { %1712 = vmatpush3.msra.mxu0 %v2140_v27 }
 0x125   :  { %1713 = vmatprep.subr.mxu0 %v1960_v2 }
 0x126   :  { %1714 = vmatpush3.msra.mxu0 %v2150_v29 }
 0x127   :  { %1715 = vmatprep.subr.mxu0 %v1960_v2 }
 0x128   :  { %1716 = vmatpush3.msra.mxu0 %v2160_v31 }
 0x129   :  { %1717 = vmatprep.subr.mxu0 %v1960_v2 }
 0x12a   :  { %1718 = vmatpush3.msra.mxu0 %v2173_v34 }
 0x12b   :  { %1719 = vmatprep.subr.mxu0 %v1960_v2 }
 0x12c   :  { %1720 = vmatpush3.msra.mxu0 %v2180_v35 }
 0x12d   :  { %1759 = vmatprep.subr.mxu0 %v1960_v2 }
 0x1cd   :  { %v467_v51 = vpop.f32.mrf.mxu0 }
 0x1ce   :  { %v468_v9 = vadd.f32 %v467_v51, %v294_v60  ;;  %v1078_v60 = vld [vmem:[%s2862_s5 + $0x8] sm:$0xff] }
 0x1cf   :  { %v1653_v10 = vpop.f32.mrf.mxu0 }
 0x1d0   :  { %1914 = vtanh.f32 %v468_v9 }
 0x1dd   :  { %v2358_v12 = vpop.eup %1914 }
 0x1de   :  { %1687 = vmatmul.mubr.f32.vlgmr.msra.gmra.mxu1 %v2358_v12 }
 0x1df   :  { %1725 = vmatpush3.msra.mxu1 %v2032_v5  ;;  %1756 = vmatprep.mubr.msk.f32.mxu1 %vm1961_vm0, %v1960_v2 }
 0x1e0   :  { %1726 = vmatprep.subr.mxu1 %v1960_v2 }
 0x1e1   :  { %1727 = vmatpush3.msra.mxu1 %v2038_v6 }
 0x1e2   :  { %1728 = vmatprep.subr.mxu1 %v1960_v2 }
 0x1e3   :  { %1729 = vmatpush3.msra.mxu1 %v2047_v8 }
 0x1e4   :  { %1730 = vmatprep.subr.mxu1 %v1960_v2 }
 0x1e5   :  { %1731 = vmatpush3.msra.mxu1 %v2061_v11 }
 0x1e6   :  { %1732 = vmatprep.subr.mxu1 %v1960_v2 }
 0x1e7   :  { %1733 = vmatpush3.msra.mxu1 %v2070_v13 }
 0x1e8   :  { %1734 = vmatprep.subr.mxu1 %v1960_v2 }
 0x1e9   :  { %1735 = vmatpush3.msra.mxu1 %v2080_v15 }
 0x1ea   :  { %1736 = vmatprep.subr.mxu1 %v1960_v2 }
 0x1eb   :  { %1737 = vmatpush3.msra.mxu1 %v2090_v17 }
 0x1ec   :  { %1738 = vmatprep.subr.mxu1 %v1960_v2 }
 0x1ed   :  { %1739 = vmatpush3.msra.mxu1 %v2100_v19 }
 0x1ee   :  { %1740 = vmatprep.subr.mxu1 %v1960_v2 }
 0x1ef   :  { %1741 = vmatpush3.msra.mxu1 %v2110_v21 }
 0x1f0   :  { %1742 = vmatprep.subr.mxu1 %v1960_v2 }
 0x1f1   :  { %1743 = vmatpush3.msra.mxu1 %v2120_v23 }
 0x1f2   :  { %1744 = vmatprep.subr.mxu1 %v1960_v2 }
 0x1f3   :  { %1745 = vmatpush3.msra.mxu1 %v2130_v25 }
 0x1f4   :  { %1746 = vmatprep.subr.mxu1 %v1960_v2 }
 0x1f5   :  { %1747 = vmatpush3.msra.mxu1 %v2140_v27 }
 0x1f6   :  { %1748 = vmatprep.subr.mxu1 %v1960_v2 }
 0x1f7   :  { %1749 = vmatpush3.msra.mxu1 %v2150_v29 }
 0x1f8   :  { %1750 = vmatprep.subr.mxu1 %v1960_v2 }
 0x1f9   :  { %1751 = vmatpush3.msra.mxu1 %v2160_v31 }
 0x1fa   :  { %1752 = vmatprep.subr.mxu1 %v1960_v2 }
 0x1fb   :  { %1753 = vmatpush3.msra.mxu1 %v2173_v34 }
 0x1fc   :  { %1754 = vmatprep.subr.mxu1 %v1960_v2 }
 0x1fd   :  { %1755 = vmatpush3.msra.mxu1 %v2180_v35 }
 0x1fe   :  { %1794 = vmatprep.subr.mxu1 %v1960_v2 }
 0x29e   :  { %v542_v14 = vpop.f32.mrf.mxu1 }
 0x29f   :  { %v543_v16 = vadd.f32 %v542_v14, %v295_v61  ;;  %v1077_v61 = vld [vmem:[%s2862_s5] sm:$0xff] }
 0x2a0   :  { %v1688_v18 = vpop.f32.mrf.mxu1 }
 0x2a1   :  { %1916 = vtanh.f32 %v543_v16 }
 0x2ae   :  { %v1917_v20 = vpop.eup %1916 }
 0x2af   :  { %1722 = vmatmul.mubr.f32.vlgmr.msra.gmra.mxu0 %v1917_v20  ;;  %v933_v28 = vcombine.low %v2321_v7, %v1917_v20  ;;  %v934_v30 = vcombine.high %v2321_v7, %v1917_v20 }
 0x2b0   :  { %1760 = vmatpush3.msra.mxu0 %v2032_v5  ;;  %1791 = vmatprep.mubr.msk.f32.mxu0 %vm1961_vm0, %v1960_v2 }
 0x2b1   :  { %1761 = vmatprep.subr.mxu0 %v1960_v2  ;;  %v2444_v37 = vrot.slane %v933_v28, %v2277_v54  ;;  %v2450_v40 = vrot.slane %v934_v30, %v2277_v54 }
 0x2b2   :  { %1762 = vmatpush3.msra.mxu0 %v2038_v6 }
 0x2b3   :  { %1763 = vmatprep.subr.mxu0 %v1960_v2 }
 0x2b4   :  { %1764 = vmatpush3.msra.mxu0 %v2047_v8 }
 0x2b5   :  { %1765 = vmatprep.subr.mxu0 %v1960_v2 }
 0x2b6   :  { %1766 = vmatpush3.msra.mxu0 %v2061_v11 }
 0x2b7   :  { %1767 = vmatprep.subr.mxu0 %v1960_v2 }
 0x2b8   :  { %1768 = vmatpush3.msra.mxu0 %v2070_v13 }
 0x2b9   :  { %1769 = vmatprep.subr.mxu0 %v1960_v2 }
 0x2ba   :  { %1770 = vmatpush3.msra.mxu0 %v2080_v15 }
 0x2bb   :  { %1771 = vmatprep.subr.mxu0 %v1960_v2 }
 0x2bc   :  { %1772 = vmatpush3.msra.mxu0 %v2090_v17 }
 0x2bd   :  { %1773 = vmatprep.subr.mxu0 %v1960_v2 }
 0x2be   :  { %1774 = vmatpush3.msra.mxu0 %v2100_v19 }
 0x2bf   :  { %1775 = vmatprep.subr.mxu0 %v1960_v2 }
 0x2c0   :  { %1776 = vmatpush3.msra.mxu0 %v2110_v21 }
 0x2c1   :  { %1777 = vmatprep.subr.mxu0 %v1960_v2 }
 0x2c2   :  { %1778 = vmatpush3.msra.mxu0 %v2120_v23 }
 0x2c3   :  { %1779 = vmatprep.subr.mxu0 %v1960_v2 }
 0x2c4   :  { %1780 = vmatpush3.msra.mxu0 %v2130_v25 }
 0x2c5   :  { %1781 = vmatprep.subr.mxu0 %v1960_v2 }
 0x2c6   :  { %1782 = vmatpush3.msra.mxu0 %v2140_v27 }
 0x2c7   :  { %1783 = vmatprep.subr.mxu0 %v1960_v2 }
 0x2c8   :  { %1784 = vmatpush3.msra.mxu0 %v2150_v29 }
 0x2c9   :  { %1785 = vmatprep.subr.mxu0 %v1960_v2 }
 0x2ca   :  { %1786 = vmatpush3.msra.mxu0 %v2160_v31 }
 0x2cb   :  { %1787 = vmatprep.subr.mxu0 %v1960_v2 }
 0x2cc   :  { %1788 = vmatpush3.msra.mxu0 %v2173_v34 }
 0x2cd   :  { %1789 = vmatprep.subr.mxu0 %v1960_v2 }
 0x2ce   :  { %1790 = vmatpush3.msra.mxu0 %v2180_v35 }
 0x2cf   :  { %1829 = vmatprep.subr.mxu0 %v1960_v2 }
 0x36f   :  { %v617_v22 = vpop.f32.mrf.mxu0 }
 0x370   :  { %v618_v24 = vadd.f32 %v617_v22, %v296_v62 }
 0x371   :  { %v1723_v26 = vpop.f32.mrf.mxu0 }
 0x372   :  { %1918 = vtanh.f32 %v618_v24 }
 0x37f   :  { %v1919_v32 = vpop.eup %1918 }
 0x380   :  { %1757 = vmatmul.mubr.f32.vlgmr.msra.gmra.mxu1 %v1919_v32  ;;  %v949_v33 = vcombine.low %v2358_v12, %v1919_v32  ;;  %v950_v36 = vcombine.high %v2358_v12, %v1919_v32 }
 0x381   :  { %1795 = vmatpush3.msra.mxu1 %v2032_v5  ;;  %1826 = vmatprep.mubr.msk.f32.mxu1 %vm1961_vm0, %v1960_v2 }
 0x382   :  { %1796 = vmatprep.subr.mxu1 %v1960_v2  ;;  %v2447_v38 = vrot.slane %v949_v33, %v2277_v54  ;;  %v2453_v41 = vrot.slane %v950_v36, %v2277_v54 }
 0x383   :  { %1797 = vmatpush3.msra.mxu1 %v2038_v6 }
 0x384   :  { %1798 = vmatprep.subr.mxu1 %v1960_v2  ;;  %v997_v42 = vcombine.low %v2444_v37, %v2447_v38  ;;  %v998_v43 = vcombine.high %v2444_v37, %v2447_v38  ;;  %v1013_v45 = vcombine.low %v2450_v40, %v2453_v41  ;;  %v1014_v47 = vcombine.high %v2450_v40, %v2453_v41  ;;  %v1355_v40 = vld [vmem:[%s2865_s6] ss:$0 sm:$0xff] }
 0x385   :  { %1799 = vmatpush3.msra.mxu1 %v2047_v8 }
 0x386   :  { %1800 = vmatprep.subr.mxu1 %v1960_v2  ;;  %v1005_v20 = vrot.slane %v997_v42, %v2283_v39  ;;  %v1012_v22 = vrot.slane %v998_v43, %v2283_v39  ;;  %v1021_v30 = vrot.slane %v1013_v45, %v2283_v39  ;;  %v1028_v32 = vrot.slane %v1014_v47, %v2283_v39 }
 0x387   :  { %1801 = vmatpush3.msra.mxu1 %v2061_v11 }
 0x388   :  { %1802 = vmatprep.subr.mxu1 %v1960_v2 }
 0x389   :  { %1803 = vmatpush3.msra.mxu1 %v2070_v13 }
 0x38a   :  { %1804 = vmatprep.subr.mxu1 %v1960_v2 }
 0x38b   :  { %1805 = vmatpush3.msra.mxu1 %v2080_v15 }
 0x38c   :  { %1806 = vmatprep.subr.mxu1 %v1960_v2 }
 0x38d   :  { %1807 = vmatpush3.msra.mxu1 %v2090_v17 }
 0x38e   :  { %1808 = vmatprep.subr.mxu1 %v1960_v2 }
 0x38f   :  { %1809 = vmatpush3.msra.mxu1 %v2100_v19 }
 0x390   :  { %1810 = vmatprep.subr.mxu1 %v1960_v2 }
 0x391   :  { %1811 = vmatpush3.msra.mxu1 %v2110_v21 }
 0x392   :  { %1812 = vmatprep.subr.mxu1 %v1960_v2 }
 0x393   :  { %1813 = vmatpush3.msra.mxu1 %v2120_v23 }
 0x394   :  { %1814 = vmatprep.subr.mxu1 %v1960_v2 }
 0x395   :  { %1815 = vmatpush3.msra.mxu1 %v2130_v25 }
 0x396   :  { %1816 = vmatprep.subr.mxu1 %v1960_v2 }
 0x397   :  { %1817 = vmatpush3.msra.mxu1 %v2140_v27 }
 0x398   :  { %1818 = vmatprep.subr.mxu1 %v1960_v2 }
 0x399   :  { %1819 = vmatpush3.msra.mxu1 %v2150_v29 }
 0x39a   :  { %1820 = vmatprep.subr.mxu1 %v1960_v2 }
 0x39b   :  { %1821 = vmatpush3.msra.mxu1 %v2160_v31 }
 0x39c   :  { %1822 = vmatprep.subr.mxu1 %v1960_v2 }
 0x39d   :  { %1823 = vmatpush3.msra.mxu1 %v2173_v34 }
 0x39e   :  { %1824 = vmatprep.subr.mxu1 %v1960_v2 }
 0x39f   :  { %1825 = vmatpush3.msra.mxu1 %v2180_v35 }
 0x440   :  { %v692_v48 = vpop.f32.mrf.mxu1 }
 0x441   :  { %v693_v50 = vadd.f32 %v692_v48, %v297_v63 }
 0x442   :  { %v1758_v52 = vpop.f32.mrf.mxu1 }
 0x443   :  { %1920 = vtanh.f32 %v693_v50 }
 0x450   :  { %v2495_v46 = vpop.eup %1920 }
 0x451   :  { %1792 = vmatmul.mubr.f32.vlgmr.msra.gmra.mxu0 %v2495_v46 }
 0x452   :  { %1830 = vmatpush3.msra.mxu0 %v2032_v5  ;;  %1861 = vmatprep.mubr.msk.f32.mxu0 %vm1961_vm0, %v1960_v2 }
 0x453   :  { %1831 = vmatprep.subr.mxu0 %v1960_v2 }
 0x454   :  { %1832 = vmatpush3.msra.mxu0 %v2038_v6 }
 0x455   :  { %1833 = vmatprep.subr.mxu0 %v1960_v2 }
 0x456   :  { %1834 = vmatpush3.msra.mxu0 %v2047_v8 }
 0x457   :  { %1835 = vmatprep.subr.mxu0 %v1960_v2 }
 0x458   :  { %1836 = vmatpush3.msra.mxu0 %v2061_v11 }
 0x459   :  { %1837 = vmatprep.subr.mxu0 %v1960_v2 }
 0x45a   :  { %1838 = vmatpush3.msra.mxu0 %v2070_v13  ;;  %v1092_v13 = vld [vmem:[%s2862_s5 + $0x78] sm:$0xff] }
 0x45b   :  { %1839 = vmatprep.subr.mxu0 %v1960_v2  ;;  %1864 = vmatprep.subr.mxu1 %v1092_v13 }
 0x45c   :  { %1840 = vmatpush3.msra.mxu0 %v2080_v15 }
 0x45d   :  { %1841 = vmatprep.subr.mxu0 %v1960_v2 }
 0x45e   :  { %1842 = vmatpush3.msra.mxu0 %v2090_v17 }
 0x45f   :  { %1843 = vmatprep.subr.mxu0 %v1960_v2 }
 0x460   :  { %1844 = vmatpush3.msra.mxu0 %v2100_v19 }
 0x461   :  { %1845 = vmatprep.subr.mxu0 %v1960_v2 }
 0x462   :  { %1846 = vmatpush3.msra.mxu0 %v2110_v21 }
 0x463   :  { %1847 = vmatprep.subr.mxu0 %v1960_v2 }
 0x464   :  { %1848 = vmatpush3.msra.mxu0 %v2120_v23  ;;  %v1090_v23 = vld [vmem:[%s2862_s5 + $0x68] sm:$0xff] }
 0x465   :  { %1849 = vmatprep.subr.mxu0 %v1960_v2 }
 0x466   :  { %1850 = vmatpush3.msra.mxu0 %v2130_v25  ;;  %v1089_v25 = vld [vmem:[%s2862_s5 + $0x60] sm:$0xff] }
 0x467   :  { %1851 = vmatprep.subr.mxu0 %v1960_v2 }
 0x468   :  { %1852 = vmatpush3.msra.mxu0 %v2140_v27  ;;  %v1088_v27 = vld [vmem:[%s2862_s5 + $0x58] sm:$0xff] }
 0x469   :  { %1853 = vmatprep.subr.mxu0 %v1960_v2 }
 0x46a   :  { %1854 = vmatpush3.msra.mxu0 %v2150_v29  ;;  %v1087_v29 = vld [vmem:[%s2862_s5 + $0x50] sm:$0xff] }
 0x46b   :  { %1855 = vmatprep.subr.mxu0 %v1960_v2 }
 0x46c   :  { %1856 = vmatpush3.msra.mxu0 %v2160_v31  ;;  %v1086_v31 = vld [vmem:[%s2862_s5 + $0x48] sm:$0xff] }
 0x46d   :  { %1857 = vmatprep.subr.mxu0 %v1960_v2 }
 0x46e   :  { %1858 = vmatpush3.msra.mxu0 %v2173_v34  ;;  %v1085_v34 = vld [vmem:[%s2862_s5 + $0x40] sm:$0xff] }
 0x46f   :  { %1859 = vmatprep.subr.mxu0 %v1960_v2  ;;  %v1091_v2 = vld [vmem:[%s2862_s5 + $0x70] sm:$0xff] }
 0x470   :  { %1860 = vmatpush3.msra.mxu0 %v2180_v35  ;;  %v1084_v35 = vld [vmem:[%s2862_s5 + $0x38] sm:$0xff] }
 0x511   :  { %v767_v5 = vpop.f32.mrf.mxu0 }
 0x512   :  { %v768_v6 = vadd.f32 %v767_v5, %v298_v0 }
 0x513   :  { %v1793_v8 = vpop.f32.mrf.mxu0 }
 0x514   :  { %1922 = vtanh.f32 %v768_v6 }
 0x521   :  { %v2534_v11 = vpop.eup %1922 }
 0x522   :  { %1827 = vmatmul.mubr.f32.vlgmr.msra.gmra.mxu1 %v2534_v11 }
 0x523   :  { %1865 = vmatpush3.msra.mxu1 %v1092_v13 }
 0x524   :  { %1866 = vmatprep.subr.mxu1 %v1091_v2 }
 0x525   :  { %1867 = vmatpush3.msra.mxu1 %v1091_v2 }
 0x526   :  { %1868 = vmatprep.subr.mxu1 %v1090_v23 }
 0x527   :  { %1869 = vmatpush3.msra.mxu1 %v1090_v23 }
 0x528   :  { %1870 = vmatprep.subr.mxu1 %v1089_v25 }
 0x529   :  { %1871 = vmatpush3.msra.mxu1 %v1089_v25 }
 0x52a   :  { %1872 = vmatprep.subr.mxu1 %v1088_v27 }
 0x52b   :  { %1873 = vmatpush3.msra.mxu1 %v1088_v27 }
 0x52c   :  { %1874 = vmatprep.subr.mxu1 %v1087_v29 }
 0x52d   :  { %1875 = vmatpush3.msra.mxu1 %v1087_v29 }
 0x52e   :  { %1876 = vmatprep.subr.mxu1 %v1086_v31 }
 0x52f   :  { %1877 = vmatpush3.msra.mxu1 %v1086_v31 }
 0x530   :  { %1878 = vmatprep.subr.mxu1 %v1085_v34 }
 0x531   :  { %1879 = vmatpush3.msra.mxu1 %v1085_v34 }
 0x532   :  { %1880 = vmatprep.subr.mxu1 %v1084_v35 }
 0x533   :  { %1881 = vmatpush3.msra.mxu1 %v1084_v35 }
 0x534   :  { %1882 = vmatprep.subr.mxu1 %v1083_v49 }
 0x535   :  { %1883 = vmatpush3.msra.mxu1 %v1083_v49 }
 0x536   :  { %1884 = vmatprep.subr.mxu1 %v1082_v53 }
 0x537   :  { %1885 = vmatpush3.msra.mxu1 %v1082_v53 }
 0x538   :  { %1886 = vmatprep.subr.mxu1 %v1081_v55 }
 0x539   :  { %1887 = vmatpush3.msra.mxu1 %v1081_v55 }
 0x53a   :  { %1888 = vmatprep.subr.mxu1 %v1080_v57 }
 0x53b   :  { %1889 = vmatpush3.msra.mxu1 %v1080_v57 }
 0x53c   :  { %1890 = vmatprep.subr.mxu1 %v1079_v59 }
 0x53d   :  { %1891 = vmatpush3.msra.mxu1 %v1079_v59 }
 0x53e   :  { %1892 = vmatprep.subr.mxu1 %v1078_v60 }
 0x53f   :  { %1893 = vmatpush3.msra.mxu1 %v1078_v60 }
 0x540   :  { %1894 = vmatprep.subr.mxu1 %v1077_v61 }
 0x541   :  { %1895 = vmatpush3.msra.mxu1 %v1077_v61 }
 0x5e2   :  { %v842_v15 = vpop.f32.mrf.mxu1 }
 0x5e3   :  { %v843_v17 = vadd.f32 %v842_v15, %v299_v1 }
 0x5e4   :  { %v1828_v19 = vpop.f32.mrf.mxu1 }
 0x5e5   :  { %1924 = vtanh.f32 %v843_v17 }
 0x5f2   :  { %v1925_v21 = vpop.eup %1924 }
 0x5f3   :  { %1862 = vmatmul.mubr.f32.vlgmr.msra.gmra.mxu0 %v1925_v21  ;;  %v965_v1 = vcombine.low %v2495_v46, %v1925_v21  ;;  %v966_v4 = vcombine.high %v2495_v46, %v1925_v21 }
 0x5f5   :  { %v973_v10 = vrot.slane %v965_v1, %v2277_v54  ;;  %v980_v58 = vrot.slane %v966_v4, %v2277_v54 }
 0x6b3   :  { %v917_v62 = vpop.f32.mrf.mxu0 }
 0x6b4   :  { %v918_v63 = vadd.f32 %v917_v62, %v300_v3 }
 0x6b5   :  { %v1863_v0 = vpop.f32.mrf.mxu0 }
 0x6b6   :  { %1926 = vtanh.f32 %v918_v63 }
 0x6c3   :  { %v1927_v7 = vpop.eup %1926 }
 0x6c4   :  { %924 = vst [vmem:[%s2863_s8] sm:$0xff] %v1927_v7  ;;  %v981_v51 = vcombine.low %v2534_v11, %v1927_v7  ;;  %v982_v9 = vcombine.high %v2534_v11, %v1927_v7 }
 0x6c6   :  { %v989_v56 = vrot.slane %v981_v51, %v2277_v54  ;;  %v996_v3 = vrot.slane %v982_v9, %v2277_v54 }
 0x6c8   :  { %v1029_v12 = vcombine.low %v973_v10, %v989_v56  ;;  %v1030_v14 = vcombine.high %v973_v10, %v989_v56  ;;  %v1045_v16 = vcombine.low %v980_v58, %v996_v3  ;;  %v1046_v18 = vcombine.high %v980_v58, %v996_v3 }
 0x6ca   :  { %v1037_v24 = vrot.slane %v1029_v12, %v2283_v39  ;;  %v1044_v26 = vrot.slane %v1030_v14, %v2283_v39  ;;  %v1053_v54 = vrot.slane %v1045_v16, %v2283_v39  ;;  %v1060_v28 = vrot.slane %v1046_v18, %v2283_v39 }
 0x6cb   :  { %v2647_v39 = vand.u32 127, %v170_v44 }
 0x6cc   :  { %v1061_v33 = vcombine.low %v1005_v20, %v1037_v24  ;;  %v1062_v36 = vcombine.high %v1005_v20, %v1037_v24  ;;  %v1063_v37 = vcombine.low %v1012_v22, %v1044_v26  ;;  %v1064_v38 = vcombine.high %v1012_v22, %v1044_v26 }
 0x6cd   :  { %v1065_v42 = vcombine.low %v1021_v30, %v1053_v54  ;;  %v1066_v43 = vcombine.high %v1021_v30, %v1053_v54  ;;  %v1067_v48 = vcombine.low %v1028_v32, %v1060_v28  ;;  %v1068_v50 = vcombine.high %v1028_v32, %v1060_v28 }
 0x6ce   :  { %1069 = vst [vmem:[%s2864_s7] sm:$0xff] %v1061_v33  ;;  %1896 = vmatprep.mubr.f32.mxu1 %v1061_v33  ;;  %1070 = vst [vmem:[%s2864_s7 + $0x8] sm:$0xff] %v1062_v36  ;;  %vm1207_vm1 = vcmp.lt.s32.totalorder %v2647_v39, 3  ;;  %vm1211_vm2 = vcmp.ge.s32.totalorder %v2647_v39, 15  ;;  %vm1212_vm3 = vcmp.lt.s32.totalorder %v2647_v39, 27  ;;  %vm1208_vm5 = vcmp.ge.s32.totalorder %v2647_v39, 3 }
 0x6cf   :  { %1071 = vst [vmem:[%s2864_s7 + $0x10] sm:$0xff] %v1063_v37  ;;  %1072 = vst [vmem:[%s2864_s7 + $0x18] sm:$0xff] %v1064_v38  ;;  %1897 = vmatmul.mubr.f32.vlgmr.msra.gmra.mxu1 %v1062_v36  ;;  %vm1209_vm6 = vcmp.lt.s32.totalorder %v2647_v39, 15 }
 0x6d0   :  { %1073 = vst [vmem:[%s2864_s7 + $0x20] sm:$0xff] %v1065_v42  ;;  %1074 = vst [vmem:[%s2864_s7 + $0x28] sm:$0xff] %v1066_v43  ;;  %1899 = vmatprep.mubr.f32.mxu1 %v1063_v37 }
 0x6d1   :  { %1075 = vst [vmem:[%s2864_s7 + $0x30] sm:$0xff] %v1067_v48  ;;  %1076 = vst [vmem:[%s2864_s7 + $0x38] sm:$0xff] %v1068_v50 }
 0x6d2   :  { %vm2761_vm4 = vmand %vm1211_vm2, %vm1212_vm3 }
 0x6d3   :  { %1900 = vmatmul.mubr.f32.gmra.mxu1 %v1064_v38  ;;  %vm2769_vm7 = vmand %vm1208_vm5, %vm1209_vm6 }
 0x6d4   :  { %1902 = vmatprep.mubr.f32.mxu1 %v1065_v42 }
 0x6d7   :  { %1903 = vmatmul.mubr.f32.gmra.mxu1 %v1066_v43 }
 0x6d8   :  { %1905 = vmatprep.mubr.f32.mxu1 %v1067_v48 }
 0x6db   :  { %1906 = vmatmul.mubr.f32.gmra.mxu1 %v1068_v50 }
 0x78f   :  { %v1898_v41 = vpop.f32.mrf.mxu1 }
 0x790   :  { %v2653_v45 = vadd.f32 %v1898_v41, %v1355_v40 }
 0x791   :  { %v1166_v47 = vpop.f32.mrf.mxu1 }
 0x792   :  { %v2655_v52 = vadd.f32 %v1355_v40, %v1166_v47  ;;  %v1215_v46 = vsel %vm1207_vm1, %v2653_v45, -3.4028235e+38 }
 0x793   :  { %1224 = vmax.xlane.f32.xlu0 %v1215_v46  ;;  %v1901_v5 = vpop.f32.mrf.mxu1 }
 0x794   :  { %v2660_v44 = vadd.f32 %v1901_v5, %v1355_v40  ;;  %v1214_v13 = vsel %vm1207_vm1, %v2655_v52, -3.4028235e+38 }
 0x795   :  { %v1176_v6 = vpop.f32.mrf.mxu1 }
 0x796   :  { %v2662_v8 = vadd.f32 %v1355_v40, %v1176_v6  ;;  %v1217_v11 = vsel %vm1207_vm1, %v2660_v44, -3.4028235e+38 }
 0x797   :  { %1228 = vmax.xlane.f32.xlu1 %v1217_v11  ;;  %v1904_v2 = vpop.f32.mrf.mxu1  ;;  %1222 = vmax.xlane.f32.xlu0 %v1214_v13 }
 0x798   :  { %v2670_v17 = vadd.f32 %v1904_v2, %v1355_v40  ;;  %v1216_v21 = vsel %vm1207_vm1, %v2662_v8, -3.4028235e+38 }
 0x799   :  { %v1186_v15 = vpop.f32.mrf.mxu1 }
 0x79a   :  { %v2672_v19 = vadd.f32 %v1355_v40, %v1186_v15  ;;  %v1219_v34 = vsel %vm1207_vm1, %v2670_v17, -3.4028235e+38 }
 0x79b   :  { %v1907_v23 = vpop.f32.mrf.mxu1  ;;  %1226 = vmax.xlane.f32.xlu1 %v1216_v21 }
 0x79c   :  { %v1218_v25 = vsel %vm1207_vm1, %v2672_v19, -3.4028235e+38  ;;  %v2680_v29 = vadd.f32 %v1907_v23, %v1355_v40 }
 0x79d   :  { %v1196_v27 = vpop.f32.mrf.mxu1  ;;  %1230 = vmax.xlane.f32.xlu0 %v1218_v25 }
 0x79e   :  { %v2682_v31 = vadd.f32 %v1355_v40, %v1196_v27  ;;  %v1221_v49 = vsel %vm1207_vm1, %v2680_v29, -3.4028235e+38 }
 0x79f   :  { %1232 = vmax.xlane.f32.xlu1 %v1219_v34 }
 0x7a0   :  { %v1220_v35 = vsel %vm1207_vm1, %v2682_v31, -3.4028235e+38 }
 0x7a1   :  { %1234 = vmax.xlane.f32.xlu0 %v1220_v35 }
 0x7a3   :  { %1236 = vmax.xlane.f32.xlu1 %v1221_v49 }
 0x81c   :  { %v1225_v53 = vpop.xlane.xlu0 %1224 }
 0x81d   :  { %v1239_v55 = vsub.f32 %v2653_v45, %v1225_v53 }
 0x81f   :  { %v1247_v57 = vsel %vm1207_vm1, %v1239_v55, %v2653_v45 }
 0x820   :  { %v1256_v59 = vmul.f32 1.442695, %v1247_v57  ;;  %v1229_v60 = vpop.xlane.xlu1 %1228  ;;  %v1223_v61 = vpop.xlane.xlu0 %1222 }
 0x821   :  { %v1241_v62 = vsub.f32 %v2660_v44, %v1229_v60  ;;  %v1238_v63 = vsub.f32 %v2655_v52, %v1223_v61 }
 0x822   :  { %1928 = vpow2.f32 %v1256_v59 }
 0x823   :  { %v1249_v0 = vsel %vm1207_vm1, %v1241_v62, %v2660_v44  ;;  %v1246_v1 = vsel %vm1207_vm1, %v1238_v63, %v2655_v52 }
 0x824   :  { %v1260_v4 = vmul.f32 1.442695, %v1249_v0  ;;  %v1254_v7 = vmul.f32 1.442695, %v1246_v1  ;;  %v1227_v51 = vpop.xlane.xlu1 %1226 }
 0x825   :  { %v1240_v9 = vsub.f32 %v2662_v8, %v1227_v51 }
 0x826   :  { %1930 = vpow2.f32 %v1260_v4  ;;  %v1231_v10 = vpop.xlane.xlu0 %1230 }
 0x827   :  { %1932 = vpow2.f32 %v1254_v7  ;;  %v1248_v56 = vsel %vm1207_vm1, %v1240_v9, %v2662_v8  ;;  %v1242_v58 = vsub.f32 %v2672_v19, %v1231_v10 }
 0x828   :  { %v1258_v3 = vmul.f32 1.442695, %v1248_v56  ;;  %v1233_v12 = vpop.xlane.xlu1 %1232 }
 0x829   :  { %v1250_v14 = vsel %vm1207_vm1, %v1242_v58, %v2672_v19  ;;  %v1243_v16 = vsub.f32 %v2670_v17, %v1233_v12 }
 0x82a   :  { %1934 = vpow2.f32 %v1258_v3  ;;  %v1262_v18 = vmul.f32 1.442695, %v1250_v14  ;;  %v1235_v20 = vpop.xlane.xlu0 %1234 }
 0x82b   :  { %v1251_v22 = vsel %vm1207_vm1, %v1243_v16, %v2670_v17  ;;  %v1244_v24 = vsub.f32 %v2682_v31, %v1235_v20 }
 0x82c   :  { %v1264_v26 = vmul.f32 1.442695, %v1251_v22  ;;  %v1237_v54 = vpop.xlane.xlu1 %1236  ;;  %1936 = vpow2.f32 %v1262_v18 }
 0x82d   :  { %v1252_v28 = vsel %vm1207_vm1, %v1244_v24, %v2682_v31  ;;  %v1245_v30 = vsub.f32 %v2680_v29, %v1237_v54 }
 0x82e   :  { %1938 = vpow2.f32 %v1264_v26  ;;  %v1266_v32 = vmul.f32 1.442695, %v1252_v28 }
 0x82f   :  { %v1929_v33 = vpop.eup %1928  ;;  %v1253_v36 = vsel %vm1207_vm1, %v1245_v30, %v2680_v29 }
 0x830   :  { %v1268_v37 = vmul.f32 1.442695, %v1253_v36  ;;  %v1271_v38 = vsel %vm1207_vm1, %v1929_v33, 0.0  ;;  %1940 = vpow2.f32 %v1266_v32  ;;  %v1311_v49 = vsel %vm2761_vm4, %v1929_v33, 0.0 }
 0x831   :  { %1280 = vadd.xlane.f32.xlu1 %v1271_v38  ;;  %v1319_v60 = vsel %vm2769_vm7, %v2653_v45, %v1311_v49 }
 0x832   :  { %1942 = vpow2.f32 %v1268_v37 }
 0x833   :  { %v1931_v42 = vpop.eup %1930 }
 0x834   :  { %v1933_v43 = vpop.eup %1932  ;;  %v1273_v48 = vsel %vm1207_vm1, %v1931_v42, 0.0  ;;  %v1313_v62 = vsel %vm2761_vm4, %v1931_v42, 0.0 }
 0x835   :  { %1284 = vadd.xlane.f32.xlu1 %v1273_v48  ;;  %v1270_v50 = vsel %vm1207_vm1, %v1933_v43, 0.0  ;;  %v1310_v4 = vsel %vm2761_vm4, %v1933_v43, 0.0  ;;  %v1321_v51 = vsel %vm2769_vm7, %v2660_v44, %v1313_v62 }
 0x836   :  { %1278 = vadd.xlane.f32.xlu0 %v1270_v50  ;;  %v1318_v56 = vsel %vm2769_vm7, %v2655_v52, %v1310_v4 }
 0x837   :  { %v1935_v40 = vpop.eup %1934 }
 0x838   :  { %v1272_v41 = vsel %vm1207_vm1, %v1935_v40, 0.0  ;;  %v1312_v58 = vsel %vm2761_vm4, %v1935_v40, 0.0 }
 0x839   :  { %v2733_v47 = vpop.eup %1936  ;;  %v1320_v14 = vsel %vm2769_vm7, %v2662_v8, %v1312_v58 }
 0x83a   :  { %1282 = vadd.xlane.f32.xlu0 %v1272_v41  ;;  %v1274_v6 = vsel %vm1207_vm1, %v2733_v47, 0.0  ;;  %v1314_v18 = vsel %vm2761_vm4, %v2733_v47, 0.0 }
 0x83b   :  { %v2735_v46 = vpop.eup %1938  ;;  %v1322_v30 = vsel %vm2769_vm7, %v2672_v19, %v1314_v18 }
 0x83c   :  { %v1275_v5 = vsel %vm1207_vm1, %v2735_v46, 0.0  ;;  %v1315_v52 = vsel %vm2761_vm4, %v2735_v46, 0.0 }
 0x83d   :  { %1288 = vadd.xlane.f32.xlu1 %v1275_v5  ;;  %v2743_v11 = vpop.eup %1940  ;;  %v1323_v26 = vsel %vm2769_vm7, %v2670_v17, %v1315_v52 }
 0x83e   :  { %1286 = vadd.xlane.f32.xlu0 %v1274_v6  ;;  %v2756_v15 = vsel %vm1207_vm1, %v2743_v11, 0.0  ;;  %v1316_v33 = vsel %vm2761_vm4, %v2743_v11, 0.0 }
 0x83f   :  { %v2745_v13 = vpop.eup %1942  ;;  %v1324_v43 = vsel %vm2769_vm7, %v2682_v31, %v1316_v33 }
 0x840   :  { %v2750_v2 = vsel %vm1207_vm1, %v2745_v13, 0.0  ;;  %v1317_v8 = vsel %vm2761_vm4, %v2745_v13, 0.0 }
 0x841   :  { %1292 = vadd.xlane.f32.xlu1 %v2750_v2  ;;  %v1325_v19 = vsel %vm2769_vm7, %v2680_v29, %v1317_v8 }
 0x842   :  { %1290 = vadd.xlane.f32.xlu0 %v2756_v15 }
 0x8ba   :  { %v1281_v21 = vpop.xlane.xlu1 %1280 }
 0x8bb   :  { %1944 = vrcp.f32 %v1281_v21 }
 0x8be   :  { %v1285_v23 = vpop.xlane.xlu1 %1284 }
 0x8bf   :  { %1946 = vrcp.f32 %v1285_v23  ;;  %v1279_v25 = vpop.xlane.xlu0 %1278 }
 0x8c0   :  { %1948 = vrcp.f32 %v1279_v25 }
 0x8c3   :  { %v1283_v27 = vpop.xlane.xlu0 %1282 }
 0x8c4   :  { %1950 = vrcp.f32 %v1283_v27 }
 0x8c6   :  { %v1289_v35 = vpop.xlane.xlu1 %1288 }
 0x8c7   :  { %1952 = vrcp.f32 %v1289_v35  ;;  %v1287_v55 = vpop.xlane.xlu0 %1286 }
 0x8c8   :  { %v1945_v57 = vpop.eup %1944  ;;  %1954 = vrcp.f32 %v1287_v55 }
 0x8c9   :  { %v1297_v59 = vmul.f32 %v1945_v57, %v1271_v38 }
 0x8ca   :  { %v1293_v61 = vpop.xlane.xlu1 %1292 }
 0x8cb   :  { %v1327_v63 = vsel %vm1207_vm1, %v1297_v59, %v1319_v60  ;;  %1956 = vrcp.f32 %v1293_v61  ;;  %v1291_v0 = vpop.xlane.xlu0 %1290 }
 0x8cc   :  { %v1947_v1 = vpop.eup %1946  ;;  %1335 = vst [vmem:[%s2866_s9 + $0x8] sm:$0xff] %v1327_v63  ;;  %1958 = vrcp.f32 %v1291_v0 }
 0x8cd   :  { %v1949_v7 = vpop.eup %1948  ;;  %v1301_v45 = vmul.f32 %v1947_v1, %v1273_v48 }
 0x8ce   :  { %v1295_v9 = vmul.f32 %v1949_v7, %v1270_v50 }
 0x8cf   :  { %v1329_v10 = vsel %vm1207_vm1, %v1301_v45, %v1321_v51 }
 0x8d0   :  { %1337 = vst [vmem:[%s2866_s9 + $0x18] sm:$0xff] %v1329_v10  ;;  %v1326_v3 = vsel %vm1207_vm1, %v1295_v9, %v1318_v56 }
 0x8d1   :  { %v1951_v12 = vpop.eup %1950  ;;  %1334 = vst [vmem:[%s2866_s9] sm:$0xff] %v1326_v3 }
 0x8d2   :  { %v1299_v44 = vmul.f32 %v1951_v12, %v1272_v41 }
 0x8d4   :  { %v1953_v16 = vpop.eup %1952  ;;  %v1328_v20 = vsel %vm1207_vm1, %v1299_v44, %v1320_v14 }
 0x8d5   :  { %v1955_v22 = vpop.eup %1954  ;;  %1336 = vst [vmem:[%s2866_s9 + $0x10] sm:$0xff] %v1328_v20  ;;  %v1305_v24 = vmul.f32 %v1953_v16, %v1275_v5 }
 0x8d6   :  { %v1303_v54 = vmul.f32 %v1955_v22, %v1274_v6 }
 0x8d7   :  { %v1331_v28 = vsel %vm1207_vm1, %v1305_v24, %v1323_v26 }
 0x8d8   :  { %v1957_v32 = vpop.eup %1956  ;;  %1339 = vst [vmem:[%s2866_s9 + $0x28] sm:$0xff] %v1331_v28  ;;  %v1330_v17 = vsel %vm1207_vm1, %v1303_v54, %v1322_v30 }
 0x8d9   :  { %v1959_v36 = vpop.eup %1958  ;;  %1338 = vst [vmem:[%s2866_s9 + $0x20] sm:$0xff] %v1330_v17  ;;  %v1309_v37 = vmul.f32 %v1957_v32, %v2750_v2 }
 0x8da   :  { %v1307_v38 = vmul.f32 %v1959_v36, %v2756_v15 }
 0x8db   :  { %v1333_v42 = vsel %vm1207_vm1, %v1309_v37, %v1325_v19 }
 0x8dc   :  { %1341 = vst [vmem:[%s2866_s9 + $0x38] sm:$0xff] %v1333_v42  ;;  %v1332_v48 = vsel %vm1207_vm1, %v1307_v38, %v1324_v43 }
 0x8dd   :  { %1340 = vst [vmem:[%s2866_s9 + $0x30] sm:$0xff] %v1332_v48 }

</bundles_post_ra>
